<compile_context>
chip_gen: v6e
topology: v6e:2x2x1
jax: 0.10.0
libtpu: 0.0.40
codegen_flags: <defaults>
</compile_context>

<pallas_src>
import jax
import jax.numpy as jnp
import numpy as np
from jax.experimental import pallas as pl
from jax.experimental.pallas import tpu as pltpu

SEQ = 77
HID = 768


def _ptuner_kernel(corr_ref, x_ref, o_ref):
    # corr_ref: VMEM (1, S*H)   -- resident rank-1 correction row (beta * b @ a)
    # x_ref:    VMEM (TB, S*H)  -- batch tile of the flattened input
    # o_ref:    VMEM (TB, S*H)
    # Sublane-replicated row broadcast + add on the VPU; fully lane-dense stores.
    o_ref[...] = x_ref[...] + corr_ref[...]


def ptuner_forward(x, b, a, beta=1.0, tb=8):
    """x: (B, S, H); b: (1, S, 1); a: (1, 1, H).  Returns x + beta * (b @ a)."""
    B, S, H = x.shape
    SH = S * H
    dtype = x.dtype

    # Precompute the tiny rank-1 correction (S*H elements, ~236 KB) once in f32,
    # flattened to a lane-dense (1, S*H) row.  Read from HBM a single time by the
    # kernel (resident block), so it costs nothing at large B.
    corr = (jnp.asarray(beta, jnp.float32)
            * b.astype(jnp.float32).reshape(S, 1)
            * a.astype(jnp.float32).reshape(1, H))
    corr = corr.reshape(1, SH).astype(dtype)

    x2 = x.reshape(B, SH)

    # Batch tiling: ~2 MB f32 tiles at tb=8 keep pipelined VMEM (2x in + 2x out bufs
    # + resident corr, ~8 MB) inside even v5e's 16 MiB default scoped limit and well
    # under v7x's 32 MiB, while amortizing the ~0.35 us per-grid-step overhead.
    if B <= tb:
        tb_eff = B                      # single block covers the whole (small) batch
        bp = B
    else:
        tb_eff = tb                     # tb is a multiple of 8 -> valid sublane block
        bp = pl.cdiv(B, tb_eff) * tb_eff
        if bp != B:
            x2 = jnp.pad(x2, ((0, bp - B), (0, 0)))

    grid = (bp // tb_eff,)
    itemsize = jnp.dtype(dtype).itemsize
    cost = pl.CostEstimate(
        flops=bp * SH,                              # one add per element
        transcendentals=0,
        bytes_accessed=(2 * bp * SH + SH) * itemsize,
    )

    out2 = pl.pallas_call(
        _ptuner_kernel,
        out_shape=jax.ShapeDtypeStruct((bp, SH), dtype),
        grid_spec=pltpu.PrefetchScalarGridSpec(
            num_scalar_prefetch=0,
            grid=grid,
            in_specs=[
                pl.BlockSpec((1, SH), lambda i: (0, 0)),        # corr (resident)
                pl.BlockSpec((tb_eff, SH), lambda i: (i, 0)),   # x batch tile
            ],
            out_specs=pl.BlockSpec((tb_eff, SH), lambda i: (i, 0)),
        ),
        compiler_params=pltpu.CompilerParams(
            dimension_semantics=("parallel",),
        ),
        cost_estimate=cost,
    )(corr, x2)

    if bp != B:
        out2 = out2[:B]
    return out2.reshape(B, S, H)


if __name__ == "__main__":
    key = jax.random.PRNGKey(0)
    kx, ka, kb = jax.random.split(key, 3)

    B = 2
    x = jax.random.normal(kx, (B, SEQ, HID), dtype=jnp.float32)

    # Parameters per module __init__ shapes.  The PyTorch module initializes b to
    # zeros and a to randn; here both are nonzero so the rank-1 path is exercised.
    a = jax.random.normal(ka, (1, 1, HID), dtype=jnp.float32)
    b = 0.1 * jax.random.normal(kb, (1, SEQ, 1), dtype=jnp.float32)
    beta = 0.5

    out = jax.block_until_ready(ptuner_forward(x, b, a, beta))

    # Reference (plain JAX, mirrors torch semantics: x + beta * (b @ a)).
    ref = x + beta * jnp.matmul(b, a)
    np.testing.assert_allclose(np.asarray(out), np.asarray(ref), rtol=1e-6, atol=1e-6)

    print("KERNEL_OK")
</pallas_src>

<mosaic_0001>
module attributes {stable_mosaic.version = 11 : i64} {
  func.func @_ptuner_kernel(%arg0: i32, %arg1: memref<1x59136xf32, #tpu.memory_space<vmem>>, %arg2: memref<2x59136xf32, #tpu.memory_space<vmem>>, %arg3: memref<2x59136xf32, #tpu.memory_space<vmem>>) attributes {dimension_semantics = [#tpu.dimension_semantics<parallel>], iteration_bounds = array<i64: 1>, scalar_prefetch = 0 : i64, scratch_operands = 0 : i64, tpu.core_type = #tpu.core_type<tc>, window_params = [{pipeline_mode = #tpu.pipeline_mode<synchronous>, transform_indices = @transform_0, window_bounds = array<i64: 1, 59136>}, {transform_indices = @transform_1, window_bounds = array<i64: 2, 59136>}, {transform_indices = @transform_2, window_bounds = array<i64: 2, 59136>}]} {
    %c0 = arith.constant 0 : index
    %c0_0 = arith.constant 0 : index
    %0 = vector.load %arg2[%c0, %c0_0] : memref<2x59136xf32, #tpu.memory_space<vmem>>, vector<2x59136xf32>
    %c0_1 = arith.constant 0 : index
    %c0_2 = arith.constant 0 : index
    %1 = vector.load %arg1[%c0_1, %c0_2] : memref<1x59136xf32, #tpu.memory_space<vmem>>, vector<1x59136xf32>
    %2 = vector.broadcast %1 : vector<1x59136xf32> to vector<2x59136xf32>
    %3 = arith.addf %0, %2 : vector<2x59136xf32>
    %c0_3 = arith.constant 0 : index
    %c0_4 = arith.constant 0 : index
    %4 = vector.load %arg3[%c0_3, %c0_4] : memref<2x59136xf32, #tpu.memory_space<vmem>>, vector<2x59136xf32>
    tpu.vector_store %arg3[%c0_3, %c0_4], %3 {strides = array<i32>} : memref<2x59136xf32, #tpu.memory_space<vmem>>, vector<2x59136xf32>,
    return
  }
  func.func @transform_0(%arg0: i32) -> (i32, i32) {
    %c0_i32 = arith.constant 0 : i32
    %c0_i32_0 = arith.constant 0 : i32
    %c0_i32_1 = arith.constant 0 : i32
    return %c0_i32, %c0_i32_0 : i32, i32
  }
  func.func @transform_1(%arg0: i32) -> (i32, i32) {
    %c0_i32 = arith.constant 0 : i32
    %c0_i32_0 = arith.constant 0 : i32
    return %arg0, %c0_i32 : i32, i32
  }
  func.func @transform_2(%arg0: i32) -> (i32, i32) {
    %c0_i32 = arith.constant 0 : i32
    %c0_i32_0 = arith.constant 0 : i32
    return %arg0, %c0_i32 : i32, i32
  }
}

</mosaic_0001>

<bundles_post_ra>
// kernel: tpu_custom_call.1
= control target key start
LH: loop header
LB: loop body
LE: loop exit
PB: predicated region body
PF: predicated region fallthrough
CT: control target
= control target key end

     0   :  { %7 = vsyncpa [#allocation3], 0  ;;  %s5252_s0 = inlined_call_operand.hbm [shape: f32[1,59136], index: 0, kind: input, shape index: {}]   ;;  %s5253_s1 = inlined_call_operand.hbm [shape: f32[2,59136], index: 1, kind: input, shape index: {}]   ;;  %s5254_s2 = inlined_call_operand.hbm [shape: f32[2,59136], index: 2, kind: output, shape index: {}]  }
   0x1   :  { %8 = vsyncpa [#allocation6], 0 }
   0x2   :  { %9 = vsyncpa [#allocation4], 0  ;;  %s4513_s9 = smov [#allocation2]   ;;  %s4514_s11 = smov [#allocation5]  }
   0x3   :  { %s16_s10 = sshll.u32 %s4513_s9, 4  ;;  %s26_s12 = sshll.u32 %s4514_s11, 4  ;;  %s17_s10 = int_to_ptr.vmem [resolvable:$true] %s16_s10  ;;  %s27_s12 = int_to_ptr.vmem [resolvable:$true] %s26_s12 }
   0x4   :  { %s4455_s13 = scalar_lea.vmem %s17_s10, 7392  ;;  %p4460_p1 = scmp.lt.s32.totalorder %s17_s10, %s17_s10 }
   0x5   :  { %p4456_p0 = scmp.ne.s32.totalorder %s17_s10, %s4455_s13  ;;  %p4461_p2 = scmp.lt.s32.totalorder %s4455_s13, %s4455_s13 }
   0x7   :  { %p4462_p3 = por %p4461_p2, %p4460_p1 }
   0x9   :  { %p4463_p4 = pnand %p4462_p3, %p4456_p0 }
   0xb   :  { %4466 = shalt.err (!%p4463_p4)
}
   0xc   :  { %19 = dma.hbm_to_vmem [thread:$0]  %s5252_s0, 7392, %s17_s10, [#allocation3]  }
   0xd   :  { %s4475_s16 = scalar_lea.vmem %s27_s12, 14784  ;;  %p4480_p6 = scmp.lt.s32.totalorder %s27_s12, %s27_s12 }
   0xe   :  { %p4476_p5 = scmp.ne.s32.totalorder %s27_s12, %s4475_s16  ;;  %p4481_p7 = scmp.lt.s32.totalorder %s4475_s16, %s4475_s16 }
  0x10   :  { %p4482_p8 = por %p4481_p7, %p4480_p6 }
  0x12   :  { %p4483_p9 = pnand %p4482_p8, %p4476_p5 }
  0x14   :  { %4486 = shalt.err (!%p4483_p9)
}
  0x15   :  { %29 = dma.hbm_to_vmem [thread:$0]  %s5253_s1, 14784, %s27_s12, [#allocation6]  }
  0x16   :  { %4507 = dma.done.wait [#allocation3], 7392  }
  0x17   :  { %4508 = vsyncadd [#allocation3], 4294959904 }
  0x18   :  { %4509 = dma.done.wait [#allocation6], 14784  }
  0x19   :  { %4510 = vsyncadd [#allocation6], 4294952512  ;;  %v268_v0 = vlaneseq  ;;  %v4515_v1 = vmov 1983009808   ;;  %v152_v13 = vld [vmem:[#allocation2] sm:$0xff]  ;;  %v153_v19 = vld [vmem:[#allocation2 + $0x8] sm:$0xff] }
  0x1a   :  { %v2119_v2 = vunpack.c.l.s4 %v4515_v1  ;;  %v154_v36 = vld [vmem:[#allocation2 + $0x10] sm:$0xff]  ;;  %v38_v52 = vld [vmem:[#allocation5 + $0x10] sm:$0xff]  ;;  %s4516_s0 = smov [#allocation7]  }
  0x1b   :  { %v269_v3 = vshrl.u32 %v268_v0, 7  ;;  %v36_v37 = vld [vmem:[#allocation5] sm:$0xff]  ;;  %v37_v43 = vld [vmem:[#allocation5 + $0x8] sm:$0xff]  ;;  %s4433_s1 = sshll.u32 %s4516_s0, 4  ;;  %s4434_s1 = int_to_ptr.vmem [resolvable:$true] %s4433_s1 }
  0x1c   :  { %v2120_v4 = vunpack.c.0.s8 %v2119_v2  ;;  %v155_v60 = vld [vmem:[#allocation2 + $0x18] sm:$0xff]  ;;  %v39_v2 = vld [vmem:[#allocation5 + $0x18] sm:$0xff]  ;;  %s4487_s19 = scalar_lea.vmem %s4434_s1, 14784  ;;  %p4492_p11 = scmp.lt.s32.totalorder %s4434_s1, %s4434_s1 }
  0x1d   :  { %v4538_v5 = vsub.s32 0, %v269_v3  ;;  %v4540_v6 = vsub.s32 1, %v269_v3  ;;  %v4542_v7 = vsub.s32 2, %v269_v3  ;;  %v4544_v8 = vsub.s32 3, %v269_v3  ;;  %p4488_p10 = scmp.ne.s32.totalorder %s4434_s1, %s4487_s19  ;;  %p4493_p12 = scmp.lt.s32.totalorder %s4487_s19, %s4487_s19 }
  0x1e   :  { %v4546_v9 = vsub.s32 4, %v269_v3  ;;  %v4548_v10 = vsub.s32 5, %v269_v3  ;;  %v4550_v11 = vsub.s32 6, %v269_v3  ;;  %v4552_v12 = vsub.s32 7, %v269_v3 }
  0x1f   :  { %v4554_v14 = vsub.s32 %v2120_v4, %v269_v3  ;;  %v271_v15 = vrot.slane %v152_v13, %v4538_v5  ;;  %v275_v16 = vrot.slane %v152_v13, %v4540_v6  ;;  %v279_v17 = vrot.slane %v152_v13, %v4542_v7  ;;  %p4494_p13 = por %p4493_p12, %p4492_p11 }
  0x20   :  { %v283_v18 = vrot.slane %v152_v13, %v4544_v8  ;;  %v287_v20 = vrot.slane %v152_v13, %v4546_v9  ;;  %v291_v21 = vrot.slane %v152_v13, %v4548_v10  ;;  %v295_v22 = vrot.slane %v152_v13, %v4550_v11 }
  0x21   :  { %v299_v23 = vrot.slane %v152_v13, %v4552_v12  ;;  %v2116_v24 = vcombine.low %v271_v15, %v275_v16  ;;  %v303_v26 = vrot.slane %v153_v19, %v4538_v5  ;;  %v307_v27 = vrot.slane %v153_v19, %v4540_v6  ;;  %p4495_p0 = pnand %p4494_p13, %p4488_p10 }
  0x22   :  { %v2117_v25 = vcombine.low %v279_v17, %v283_v18  ;;  %v2133_v28 = vcombine.low %v287_v20, %v291_v21  ;;  %v311_v30 = vrot.slane %v153_v19, %v4542_v7  ;;  %v315_v31 = vrot.slane %v153_v19, %v4544_v8 }
  0x23   :  { %v2134_v29 = vcombine.low %v295_v22, %v299_v23  ;;  %v2124_v32 = vrot.slane %v2116_v24, %v4554_v14  ;;  %v2150_v34 = vcombine.low %v303_v26, %v307_v27  ;;  %v319_v35 = vrot.slane %v153_v19, %v4546_v9  ;;  %v156_v23 = vld [vmem:[#allocation2 + $0x20] sm:$0xff] }
  0x24   :  { %v2131_v33 = vrot.slane %v2117_v25, %v4554_v14  ;;  %v2141_v38 = vrot.slane %v2133_v28, %v4554_v14  ;;  %v2151_v40 = vcombine.low %v311_v30, %v315_v31  ;;  %v323_v41 = vrot.slane %v153_v19, %v4548_v10  ;;  %v40_v25 = vld [vmem:[#allocation5 + $0x20] sm:$0xff] }
  0x25   :  { %v2148_v39 = vrot.slane %v2134_v29, %v4554_v14  ;;  %v2158_v44 = vrot.slane %v2150_v34, %v4554_v14  ;;  %v327_v45 = vrot.slane %v153_v19, %v4550_v11  ;;  %v331_v46 = vrot.slane %v153_v19, %v4552_v12 }
  0x26   :  { %v2132_v42 = vcombine.low %v2124_v32, %v2131_v33  ;;  %v2165_v48 = vrot.slane %v2151_v40, %v4554_v14  ;;  %v2167_v49 = vcombine.low %v319_v35, %v323_v41  ;;  %v335_v50 = vrot.slane %v154_v36, %v4538_v5  ;;  %v41_v33 = vld [vmem:[#allocation5 + $0x28] sm:$0xff] }
  0x27   :  { %v2149_v47 = vcombine.low %v2141_v38, %v2148_v39  ;;  %v2168_v53 = vcombine.low %v327_v45, %v331_v46  ;;  %v339_v54 = vrot.slane %v154_v36, %v4540_v6  ;;  %v343_v55 = vrot.slane %v154_v36, %v4542_v7  ;;  %v157_v46 = vld [vmem:[#allocation2 + $0x28] sm:$0xff] }
  0x28   :  { %v4195_v51 = vadd.f32 %v2132_v42, %v36_v37  ;;  %v2166_v57 = vcombine.low %v2158_v44, %v2165_v48  ;;  %v2175_v58 = vrot.slane %v2167_v49, %v4554_v14  ;;  %v347_v59 = vrot.slane %v154_v36, %v4544_v8  ;;  %v42_v48 = vld [vmem:[#allocation5 + $0x30] sm:$0xff] }
  0x29   :  { %v4196_v56 = vadd.f32 %v2149_v47, %v37_v43  ;;  %v2182_v61 = vrot.slane %v2168_v53, %v4554_v14  ;;  %v2184_v62 = vcombine.low %v335_v50, %v339_v54  ;;  %v351_v63 = vrot.slane %v154_v36, %v4546_v9 }
  0x2a   :  { %4311 = vst [vmem:[#allocation7] sm:$0xff] %v4195_v51  ;;  %v355_v0 = vrot.slane %v154_v36, %v4548_v10  ;;  %v4197_v1 = vadd.f32 %v2166_v57, %v38_v52  ;;  %v2185_v3 = vcombine.low %v343_v55, %v347_v59  ;;  %v359_v4 = vrot.slane %v154_v36, %v4550_v11 }
  0x2b   :  { %4312 = vst [vmem:[#allocation7 + $0x8] sm:$0xff] %v4196_v56  ;;  %v363_v13 = vrot.slane %v154_v36, %v4552_v12  ;;  %v2183_v15 = vcombine.low %v2175_v58, %v2182_v61  ;;  %v2192_v16 = vrot.slane %v2184_v62, %v4554_v14  ;;  %v367_v18 = vrot.slane %v155_v60, %v4538_v5  ;;  %v43_v56 = vld [vmem:[#allocation5 + $0x38] sm:$0xff] }
  0x2c   :  { %v2201_v17 = vcombine.low %v351_v63, %v355_v0  ;;  %4313 = vst [vmem:[#allocation7 + $0x10] sm:$0xff] %v4197_v1  ;;  %v2199_v19 = vrot.slane %v2185_v3, %v4554_v14  ;;  %v371_v21 = vrot.slane %v155_v60, %v4540_v6  ;;  %v375_v22 = vrot.slane %v155_v60, %v4542_v7 }
  0x2d   :  { %v2202_v20 = vcombine.low %v359_v4, %v363_v13  ;;  %v4198_v24 = vadd.f32 %v2183_v15, %v39_v2  ;;  %v379_v27 = vrot.slane %v155_v60, %v4544_v8  ;;  %v383_v28 = vrot.slane %v155_v60, %v4546_v9  ;;  %v158_v13 = vld [vmem:[#allocation2 + $0x30] sm:$0xff] }
  0x2e   :  { %v2209_v26 = vrot.slane %v2201_v17, %v4554_v14  ;;  %v2200_v29 = vcombine.low %v2192_v16, %v2199_v19  ;;  %v2218_v31 = vcombine.low %v367_v18, %v371_v21  ;;  %v387_v32 = vrot.slane %v155_v60, %v4548_v10  ;;  %v44_v16 = vld [vmem:[#allocation5 + $0x40] sm:$0xff] }
  0x2f   :  { %v2216_v30 = vrot.slane %v2202_v20, %v4554_v14  ;;  %4314 = vst [vmem:[#allocation7 + $0x18] sm:$0xff] %v4198_v24  ;;  %v2219_v34 = vcombine.low %v375_v22, %v379_v27  ;;  %v391_v35 = vrot.slane %v155_v60, %v4550_v11  ;;  %v395_v36 = vrot.slane %v155_v60, %v4552_v12  ;;  %v45_v24 = vld [vmem:[#allocation5 + $0x48] sm:$0xff] }
  0x30   :  { %v399_v37 = vrot.slane %v156_v23, %v4538_v5  ;;  %v4199_v38 = vadd.f32 %v2200_v29, %v40_v25  ;;  %v2226_v40 = vrot.slane %v2218_v31, %v4554_v14  ;;  %v2235_v41 = vcombine.low %v383_v28, %v387_v32 }
  0x31   :  { %v2217_v39 = vcombine.low %v2209_v26, %v2216_v30  ;;  %v2233_v42 = vrot.slane %v2219_v34, %v4554_v14  ;;  %v2236_v43 = vcombine.low %v391_v35, %v395_v36  ;;  %v403_v44 = vrot.slane %v156_v23, %v4540_v6 }
  0x32   :  { %v407_v45 = vrot.slane %v156_v23, %v4542_v7  ;;  %4315 = vst [vmem:[#allocation7 + $0x20] sm:$0xff] %v4199_v38  ;;  %v2243_v49 = vrot.slane %v2235_v41, %v4554_v14  ;;  %v411_v50 = vrot.slane %v156_v23, %v4544_v8  ;;  %v415_v51 = vrot.slane %v156_v23, %v4546_v9 }
  0x33   :  { %v4200_v47 = vadd.f32 %v2217_v39, %v41_v33  ;;  %v2234_v52 = vcombine.low %v2226_v40, %v2233_v42  ;;  %v2250_v53 = vrot.slane %v2236_v43, %v4554_v14  ;;  %v2252_v54 = vcombine.low %v399_v37, %v403_v44  ;;  %v159_v37 = vld [vmem:[#allocation2 + $0x38] sm:$0xff] }
  0x34   :  { %v419_v55 = vrot.slane %v156_v23, %v4548_v10  ;;  %v2253_v57 = vcombine.low %v407_v45, %v411_v50  ;;  %v423_v58 = vrot.slane %v156_v23, %v4550_v11  ;;  %v427_v59 = vrot.slane %v156_v23, %v4552_v12  ;;  %v46_v39 = vld [vmem:[#allocation5 + $0x50] sm:$0xff] }
  0x35   :  { %4316 = vst [vmem:[#allocation7 + $0x28] sm:$0xff] %v4200_v47  ;;  %v431_v60 = vrot.slane %v157_v46, %v4538_v5  ;;  %v4201_v61 = vadd.f32 %v2234_v52, %v42_v48  ;;  %v2251_v62 = vcombine.low %v2243_v49, %v2250_v53  ;;  %v2260_v63 = vrot.slane %v2252_v54, %v4554_v14  ;;  %v47_v47 = vld [vmem:[#allocation5 + $0x58] sm:$0xff] }
  0x36   :  { %v2269_v0 = vcombine.low %v415_v51, %v419_v55  ;;  %v2267_v1 = vrot.slane %v2253_v57, %v4554_v14  ;;  %v2270_v2 = vcombine.low %v423_v58, %v427_v59  ;;  %v435_v3 = vrot.slane %v157_v46, %v4540_v6 }
  0x37   :  { %v439_v4 = vrot.slane %v157_v46, %v4542_v7  ;;  %4317 = vst [vmem:[#allocation7 + $0x30] sm:$0xff] %v4201_v61  ;;  %v4202_v15 = vadd.f32 %v2251_v62, %v43_v56  ;;  %v443_v18 = vrot.slane %v157_v46, %v4544_v8  ;;  %v447_v19 = vrot.slane %v157_v46, %v4546_v9  ;;  %v48_v62 = vld [vmem:[#allocation5 + $0x60] sm:$0xff] }
  0x38   :  { %v2277_v17 = vrot.slane %v2269_v0, %v4554_v14  ;;  %v2268_v20 = vcombine.low %v2260_v63, %v2267_v1  ;;  %v2284_v21 = vrot.slane %v2270_v2, %v4554_v14  ;;  %v2286_v22 = vcombine.low %v431_v60, %v435_v3  ;;  %v160_v60 = vld [vmem:[#allocation2 + $0x40] sm:$0xff] }
  0x39   :  { %v451_v23 = vrot.slane %v157_v46, %v4548_v10  ;;  %4318 = vst [vmem:[#allocation7 + $0x38] sm:$0xff] %v4202_v15  ;;  %v2287_v25 = vcombine.low %v439_v4, %v443_v18  ;;  %v455_v26 = vrot.slane %v157_v46, %v4550_v11  ;;  %v459_v27 = vrot.slane %v157_v46, %v4552_v12  ;;  %v49_v15 = vld [vmem:[#allocation5 + $0x68] sm:$0xff] }
  0x3a   :  { %v463_v28 = vrot.slane %v158_v13, %v4538_v5  ;;  %v4203_v29 = vadd.f32 %v2268_v20, %v44_v16  ;;  %v2285_v30 = vcombine.low %v2277_v17, %v2284_v21  ;;  %v2294_v31 = vrot.slane %v2286_v22, %v4554_v14 }
  0x3b   :  { %v2303_v32 = vcombine.low %v447_v19, %v451_v23  ;;  %v2301_v33 = vrot.slane %v2287_v25, %v4554_v14  ;;  %v2304_v34 = vcombine.low %v455_v26, %v459_v27  ;;  %v467_v35 = vrot.slane %v158_v13, %v4540_v6 }
  0x3c   :  { %v471_v36 = vrot.slane %v158_v13, %v4542_v7  ;;  %4319 = vst [vmem:[#allocation7 + $0x40] sm:$0xff] %v4203_v29  ;;  %v4204_v38 = vadd.f32 %v2285_v30, %v45_v24  ;;  %v475_v41 = vrot.slane %v158_v13, %v4544_v8  ;;  %v479_v42 = vrot.slane %v158_v13, %v4546_v9  ;;  %v50_v30 = vld [vmem:[#allocation5 + $0x70] sm:$0xff] }
  0x3d   :  { %v2311_v40 = vrot.slane %v2303_v32, %v4554_v14  ;;  %v2302_v43 = vcombine.low %v2294_v31, %v2301_v33  ;;  %v2318_v44 = vrot.slane %v2304_v34, %v4554_v14  ;;  %v2320_v45 = vcombine.low %v463_v28, %v467_v35  ;;  %v161_v28 = vld [vmem:[#allocation2 + $0x48] sm:$0xff] }
  0x3e   :  { %v483_v46 = vrot.slane %v158_v13, %v4548_v10  ;;  %4320 = vst [vmem:[#allocation7 + $0x48] sm:$0xff] %v4204_v38  ;;  %v2321_v48 = vcombine.low %v471_v36, %v475_v41  ;;  %v487_v49 = vrot.slane %v158_v13, %v4550_v11  ;;  %v491_v50 = vrot.slane %v158_v13, %v4552_v12  ;;  %v51_v38 = vld [vmem:[#allocation5 + $0x78] sm:$0xff] }
  0x3f   :  { %v495_v51 = vrot.slane %v159_v37, %v4538_v5  ;;  %v4205_v52 = vadd.f32 %v2302_v43, %v46_v39  ;;  %v2319_v53 = vcombine.low %v2311_v40, %v2318_v44  ;;  %v2328_v54 = vrot.slane %v2320_v45, %v4554_v14 }
  0x40   :  { %v2337_v55 = vcombine.low %v479_v42, %v483_v46  ;;  %v2335_v56 = vrot.slane %v2321_v48, %v4554_v14  ;;  %v2338_v57 = vcombine.low %v487_v49, %v491_v50  ;;  %v499_v58 = vrot.slane %v159_v37, %v4540_v6 }
  0x41   :  { %v503_v59 = vrot.slane %v159_v37, %v4542_v7  ;;  %4321 = vst [vmem:[#allocation7 + $0x50] sm:$0xff] %v4205_v52  ;;  %v4206_v61 = vadd.f32 %v2319_v53, %v47_v47  ;;  %v507_v0 = vrot.slane %v159_v37, %v4544_v8  ;;  %v511_v1 = vrot.slane %v159_v37, %v4546_v9  ;;  %v52_v53 = vld [vmem:[#allocation5 + $0x80] sm:$0xff] }
  0x42   :  { %v2345_v63 = vrot.slane %v2337_v55, %v4554_v14  ;;  %v2336_v2 = vcombine.low %v2328_v54, %v2335_v56  ;;  %v2352_v3 = vrot.slane %v2338_v57, %v4554_v14  ;;  %v2354_v4 = vcombine.low %v495_v51, %v499_v58  ;;  %v162_v51 = vld [vmem:[#allocation2 + $0x50] sm:$0xff] }
  0x43   :  { %v515_v13 = vrot.slane %v159_v37, %v4548_v10  ;;  %4322 = vst [vmem:[#allocation7 + $0x58] sm:$0xff] %v4206_v61  ;;  %v2355_v16 = vcombine.low %v503_v59, %v507_v0  ;;  %v519_v17 = vrot.slane %v159_v37, %v4550_v11  ;;  %v523_v18 = vrot.slane %v159_v37, %v4552_v12  ;;  %v53_v61 = vld [vmem:[#allocation5 + $0x88] sm:$0xff] }
  0x44   :  { %v527_v19 = vrot.slane %v160_v60, %v4538_v5  ;;  %v4207_v20 = vadd.f32 %v2336_v2, %v48_v62  ;;  %v2353_v21 = vcombine.low %v2345_v63, %v2352_v3  ;;  %v2362_v22 = vrot.slane %v2354_v4, %v4554_v14 }
  0x45   :  { %v2371_v23 = vcombine.low %v511_v1, %v515_v13  ;;  %v2369_v24 = vrot.slane %v2355_v16, %v4554_v14  ;;  %v2372_v25 = vcombine.low %v519_v17, %v523_v18  ;;  %v531_v26 = vrot.slane %v160_v60, %v4540_v6 }
  0x46   :  { %v535_v27 = vrot.slane %v160_v60, %v4542_v7  ;;  %4323 = vst [vmem:[#allocation7 + $0x60] sm:$0xff] %v4207_v20  ;;  %v4208_v29 = vadd.f32 %v2353_v21, %v49_v15  ;;  %v539_v32 = vrot.slane %v160_v60, %v4544_v8  ;;  %v543_v33 = vrot.slane %v160_v60, %v4546_v9  ;;  %v54_v21 = vld [vmem:[#allocation5 + $0x90] sm:$0xff] }
  0x47   :  { %v2379_v31 = vrot.slane %v2371_v23, %v4554_v14  ;;  %v2370_v34 = vcombine.low %v2362_v22, %v2369_v24  ;;  %v2386_v35 = vrot.slane %v2372_v25, %v4554_v14  ;;  %v2388_v36 = vcombine.low %v527_v19, %v531_v26  ;;  %v163_v19 = vld [vmem:[#allocation2 + $0x58] sm:$0xff] }
  0x48   :  { %v547_v37 = vrot.slane %v160_v60, %v4548_v10  ;;  %4324 = vst [vmem:[#allocation7 + $0x68] sm:$0xff] %v4208_v29  ;;  %v2389_v39 = vcombine.low %v535_v27, %v539_v32  ;;  %v551_v40 = vrot.slane %v160_v60, %v4550_v11  ;;  %v555_v41 = vrot.slane %v160_v60, %v4552_v12  ;;  %v55_v29 = vld [vmem:[#allocation5 + $0x98] sm:$0xff] }
  0x49   :  { %v559_v42 = vrot.slane %v161_v28, %v4538_v5  ;;  %v4209_v43 = vadd.f32 %v2370_v34, %v50_v30  ;;  %v2387_v44 = vcombine.low %v2379_v31, %v2386_v35  ;;  %v2396_v45 = vrot.slane %v2388_v36, %v4554_v14 }
  0x4a   :  { %v2405_v46 = vcombine.low %v543_v33, %v547_v37  ;;  %v2403_v47 = vrot.slane %v2389_v39, %v4554_v14  ;;  %v2406_v48 = vcombine.low %v551_v40, %v555_v41  ;;  %v563_v49 = vrot.slane %v161_v28, %v4540_v6 }
  0x4b   :  { %v567_v50 = vrot.slane %v161_v28, %v4542_v7  ;;  %4325 = vst [vmem:[#allocation7 + $0x70] sm:$0xff] %v4209_v43  ;;  %v4210_v52 = vadd.f32 %v2387_v44, %v51_v38  ;;  %v571_v55 = vrot.slane %v161_v28, %v4544_v8  ;;  %v575_v56 = vrot.slane %v161_v28, %v4546_v9  ;;  %v56_v44 = vld [vmem:[#allocation5 + $0xa0] sm:$0xff] }
  0x4c   :  { %v2413_v54 = vrot.slane %v2405_v46, %v4554_v14  ;;  %v2404_v57 = vcombine.low %v2396_v45, %v2403_v47  ;;  %v2420_v58 = vrot.slane %v2406_v48, %v4554_v14  ;;  %v2422_v59 = vcombine.low %v559_v42, %v563_v49  ;;  %v164_v42 = vld [vmem:[#allocation2 + $0x60] sm:$0xff] }
  0x4d   :  { %v579_v60 = vrot.slane %v161_v28, %v4548_v10  ;;  %4326 = vst [vmem:[#allocation7 + $0x78] sm:$0xff] %v4210_v52  ;;  %v2423_v62 = vcombine.low %v567_v50, %v571_v55  ;;  %v583_v63 = vrot.slane %v161_v28, %v4550_v11  ;;  %v587_v0 = vrot.slane %v161_v28, %v4552_v12  ;;  %v57_v52 = vld [vmem:[#allocation5 + $0xa8] sm:$0xff] }
  0x4e   :  { %v591_v1 = vrot.slane %v162_v51, %v4538_v5  ;;  %v4211_v2 = vadd.f32 %v2404_v57, %v52_v53  ;;  %v2421_v3 = vcombine.low %v2413_v54, %v2420_v58  ;;  %v2430_v4 = vrot.slane %v2422_v59, %v4554_v14 }
  0x4f   :  { %v2439_v13 = vcombine.low %v575_v56, %v579_v60  ;;  %v2437_v15 = vrot.slane %v2423_v62, %v4554_v14  ;;  %v2440_v16 = vcombine.low %v583_v63, %v587_v0  ;;  %v595_v17 = vrot.slane %v162_v51, %v4540_v6 }
  0x50   :  { %v599_v18 = vrot.slane %v162_v51, %v4542_v7  ;;  %4327 = vst [vmem:[#allocation7 + $0x80] sm:$0xff] %v4211_v2  ;;  %v4212_v20 = vadd.f32 %v2421_v3, %v53_v61  ;;  %v603_v23 = vrot.slane %v162_v51, %v4544_v8  ;;  %v607_v24 = vrot.slane %v162_v51, %v4546_v9  ;;  %v58_v3 = vld [vmem:[#allocation5 + $0xb0] sm:$0xff] }
  0x51   :  { %v2447_v22 = vrot.slane %v2439_v13, %v4554_v14  ;;  %v2438_v25 = vcombine.low %v2430_v4, %v2437_v15  ;;  %v2454_v26 = vrot.slane %v2440_v16, %v4554_v14  ;;  %v2456_v27 = vcombine.low %v591_v1, %v595_v17  ;;  %v165_v1 = vld [vmem:[#allocation2 + $0x68] sm:$0xff] }
  0x52   :  { %v611_v28 = vrot.slane %v162_v51, %v4548_v10  ;;  %4328 = vst [vmem:[#allocation7 + $0x88] sm:$0xff] %v4212_v20  ;;  %v2457_v30 = vcombine.low %v599_v18, %v603_v23  ;;  %v615_v31 = vrot.slane %v162_v51, %v4550_v11  ;;  %v619_v32 = vrot.slane %v162_v51, %v4552_v12  ;;  %v59_v20 = vld [vmem:[#allocation5 + $0xb8] sm:$0xff] }
  0x53   :  { %v623_v33 = vrot.slane %v163_v19, %v4538_v5  ;;  %v4213_v34 = vadd.f32 %v2438_v25, %v54_v21  ;;  %v2455_v35 = vcombine.low %v2447_v22, %v2454_v26  ;;  %v2464_v36 = vrot.slane %v2456_v27, %v4554_v14 }
  0x54   :  { %v2473_v37 = vcombine.low %v607_v24, %v611_v28  ;;  %v2471_v38 = vrot.slane %v2457_v30, %v4554_v14  ;;  %v2474_v39 = vcombine.low %v615_v31, %v619_v32  ;;  %v627_v40 = vrot.slane %v163_v19, %v4540_v6 }
  0x55   :  { %v631_v41 = vrot.slane %v163_v19, %v4542_v7  ;;  %4329 = vst [vmem:[#allocation7 + $0x90] sm:$0xff] %v4213_v34  ;;  %v4214_v43 = vadd.f32 %v2455_v35, %v55_v29  ;;  %v635_v46 = vrot.slane %v163_v19, %v4544_v8  ;;  %v639_v47 = vrot.slane %v163_v19, %v4546_v9  ;;  %v60_v35 = vld [vmem:[#allocation5 + $0xc0] sm:$0xff] }
  0x56   :  { %v2481_v45 = vrot.slane %v2473_v37, %v4554_v14  ;;  %v2472_v48 = vcombine.low %v2464_v36, %v2471_v38  ;;  %v2488_v49 = vrot.slane %v2474_v39, %v4554_v14  ;;  %v2490_v50 = vcombine.low %v623_v33, %v627_v40  ;;  %v166_v33 = vld [vmem:[#allocation2 + $0x70] sm:$0xff] }
  0x57   :  { %v643_v51 = vrot.slane %v163_v19, %v4548_v10  ;;  %4330 = vst [vmem:[#allocation7 + $0x98] sm:$0xff] %v4214_v43  ;;  %v2491_v53 = vcombine.low %v631_v41, %v635_v46  ;;  %v647_v54 = vrot.slane %v163_v19, %v4550_v11  ;;  %v651_v55 = vrot.slane %v163_v19, %v4552_v12  ;;  %v61_v43 = vld [vmem:[#allocation5 + $0xc8] sm:$0xff] }
  0x58   :  { %v655_v56 = vrot.slane %v164_v42, %v4538_v5  ;;  %v4215_v57 = vadd.f32 %v2472_v48, %v56_v44  ;;  %v2489_v58 = vcombine.low %v2481_v45, %v2488_v49  ;;  %v2498_v59 = vrot.slane %v2490_v50, %v4554_v14 }
  0x59   :  { %v2507_v60 = vcombine.low %v639_v47, %v643_v51  ;;  %v2505_v61 = vrot.slane %v2491_v53, %v4554_v14  ;;  %v2508_v62 = vcombine.low %v647_v54, %v651_v55  ;;  %v659_v63 = vrot.slane %v164_v42, %v4540_v6 }
  0x5a   :  { %v663_v0 = vrot.slane %v164_v42, %v4542_v7  ;;  %4331 = vst [vmem:[#allocation7 + $0xa0] sm:$0xff] %v4215_v57  ;;  %v4216_v2 = vadd.f32 %v2489_v58, %v57_v52  ;;  %v667_v13 = vrot.slane %v164_v42, %v4544_v8  ;;  %v671_v15 = vrot.slane %v164_v42, %v4546_v9  ;;  %v62_v58 = vld [vmem:[#allocation5 + $0xd0] sm:$0xff] }
  0x5b   :  { %v2515_v4 = vrot.slane %v2507_v60, %v4554_v14  ;;  %v2506_v16 = vcombine.low %v2498_v59, %v2505_v61  ;;  %v2522_v17 = vrot.slane %v2508_v62, %v4554_v14  ;;  %v2524_v18 = vcombine.low %v655_v56, %v659_v63  ;;  %v167_v56 = vld [vmem:[#allocation2 + $0x78] sm:$0xff] }
  0x5c   :  { %v675_v19 = vrot.slane %v164_v42, %v4548_v10  ;;  %4332 = vst [vmem:[#allocation7 + $0xa8] sm:$0xff] %v4216_v2  ;;  %v2525_v21 = vcombine.low %v663_v0, %v667_v13  ;;  %v679_v22 = vrot.slane %v164_v42, %v4550_v11  ;;  %v683_v23 = vrot.slane %v164_v42, %v4552_v12  ;;  %v63_v2 = vld [vmem:[#allocation5 + $0xd8] sm:$0xff] }
  0x5d   :  { %v687_v24 = vrot.slane %v165_v1, %v4538_v5  ;;  %v4217_v25 = vadd.f32 %v2506_v16, %v58_v3  ;;  %v2523_v26 = vcombine.low %v2515_v4, %v2522_v17  ;;  %v2532_v27 = vrot.slane %v2524_v18, %v4554_v14 }
  0x5e   :  { %v2541_v28 = vcombine.low %v671_v15, %v675_v19  ;;  %v2539_v29 = vrot.slane %v2525_v21, %v4554_v14  ;;  %v2542_v30 = vcombine.low %v679_v22, %v683_v23  ;;  %v691_v31 = vrot.slane %v165_v1, %v4540_v6 }
  0x5f   :  { %v695_v32 = vrot.slane %v165_v1, %v4542_v7  ;;  %4333 = vst [vmem:[#allocation7 + $0xb0] sm:$0xff] %v4217_v25  ;;  %v4218_v34 = vadd.f32 %v2523_v26, %v59_v20  ;;  %v699_v37 = vrot.slane %v165_v1, %v4544_v8  ;;  %v703_v38 = vrot.slane %v165_v1, %v4546_v9  ;;  %v64_v26 = vld [vmem:[#allocation5 + $0xe0] sm:$0xff] }
  0x60   :  { %v2549_v36 = vrot.slane %v2541_v28, %v4554_v14  ;;  %v2540_v39 = vcombine.low %v2532_v27, %v2539_v29  ;;  %v2556_v40 = vrot.slane %v2542_v30, %v4554_v14  ;;  %v2558_v41 = vcombine.low %v687_v24, %v691_v31  ;;  %v168_v24 = vld [vmem:[#allocation2 + $0x80] sm:$0xff] }
  0x61   :  { %v707_v42 = vrot.slane %v165_v1, %v4548_v10  ;;  %4334 = vst [vmem:[#allocation7 + $0xb8] sm:$0xff] %v4218_v34  ;;  %v2559_v44 = vcombine.low %v695_v32, %v699_v37  ;;  %v711_v45 = vrot.slane %v165_v1, %v4550_v11  ;;  %v715_v46 = vrot.slane %v165_v1, %v4552_v12  ;;  %v65_v34 = vld [vmem:[#allocation5 + $0xe8] sm:$0xff] }
  0x62   :  { %v719_v47 = vrot.slane %v166_v33, %v4538_v5  ;;  %v4219_v48 = vadd.f32 %v2540_v39, %v60_v35  ;;  %v2557_v49 = vcombine.low %v2549_v36, %v2556_v40  ;;  %v2566_v50 = vrot.slane %v2558_v41, %v4554_v14 }
  0x63   :  { %v2575_v51 = vcombine.low %v703_v38, %v707_v42  ;;  %v2573_v52 = vrot.slane %v2559_v44, %v4554_v14  ;;  %v2576_v53 = vcombine.low %v711_v45, %v715_v46  ;;  %v723_v54 = vrot.slane %v166_v33, %v4540_v6 }
  0x64   :  { %v727_v55 = vrot.slane %v166_v33, %v4542_v7  ;;  %4335 = vst [vmem:[#allocation7 + $0xc0] sm:$0xff] %v4219_v48  ;;  %v4220_v57 = vadd.f32 %v2557_v49, %v61_v43  ;;  %v731_v60 = vrot.slane %v166_v33, %v4544_v8  ;;  %v735_v61 = vrot.slane %v166_v33, %v4546_v9  ;;  %v66_v49 = vld [vmem:[#allocation5 + $0xf0] sm:$0xff] }
  0x65   :  { %v2583_v59 = vrot.slane %v2575_v51, %v4554_v14  ;;  %v2574_v62 = vcombine.low %v2566_v50, %v2573_v52  ;;  %v2590_v63 = vrot.slane %v2576_v53, %v4554_v14  ;;  %v2592_v0 = vcombine.low %v719_v47, %v723_v54  ;;  %v169_v47 = vld [vmem:[#allocation2 + $0x88] sm:$0xff] }
  0x66   :  { %v739_v1 = vrot.slane %v166_v33, %v4548_v10  ;;  %4336 = vst [vmem:[#allocation7 + $0xc8] sm:$0xff] %v4220_v57  ;;  %v2593_v3 = vcombine.low %v727_v55, %v731_v60  ;;  %v743_v4 = vrot.slane %v166_v33, %v4550_v11  ;;  %v747_v13 = vrot.slane %v166_v33, %v4552_v12  ;;  %v67_v57 = vld [vmem:[#allocation5 + $0xf8] sm:$0xff] }
  0x67   :  { %v751_v15 = vrot.slane %v167_v56, %v4538_v5  ;;  %v4221_v16 = vadd.f32 %v2574_v62, %v62_v58  ;;  %v2591_v17 = vcombine.low %v2583_v59, %v2590_v63  ;;  %v2600_v18 = vrot.slane %v2592_v0, %v4554_v14 }
  0x68   :  { %v2609_v19 = vcombine.low %v735_v61, %v739_v1  ;;  %v2607_v20 = vrot.slane %v2593_v3, %v4554_v14  ;;  %v2610_v21 = vcombine.low %v743_v4, %v747_v13  ;;  %v755_v22 = vrot.slane %v167_v56, %v4540_v6 }
  0x69   :  { %v759_v23 = vrot.slane %v167_v56, %v4542_v7  ;;  %4337 = vst [vmem:[#allocation7 + $0xd0] sm:$0xff] %v4221_v16  ;;  %v4222_v25 = vadd.f32 %v2591_v17, %v63_v2  ;;  %v763_v28 = vrot.slane %v167_v56, %v4544_v8  ;;  %v767_v29 = vrot.slane %v167_v56, %v4546_v9  ;;  %v68_v17 = vld [vmem:[#allocation5 + $0x100] sm:$0xff] }
  0x6a   :  { %v2617_v27 = vrot.slane %v2609_v19, %v4554_v14  ;;  %v2608_v30 = vcombine.low %v2600_v18, %v2607_v20  ;;  %v2624_v31 = vrot.slane %v2610_v21, %v4554_v14  ;;  %v2626_v32 = vcombine.low %v751_v15, %v755_v22  ;;  %v170_v15 = vld [vmem:[#allocation2 + $0x90] sm:$0xff] }
  0x6b   :  { %v771_v33 = vrot.slane %v167_v56, %v4548_v10  ;;  %4338 = vst [vmem:[#allocation7 + $0xd8] sm:$0xff] %v4222_v25  ;;  %v2627_v35 = vcombine.low %v759_v23, %v763_v28  ;;  %v775_v36 = vrot.slane %v167_v56, %v4550_v11  ;;  %v779_v37 = vrot.slane %v167_v56, %v4552_v12  ;;  %v69_v25 = vld [vmem:[#allocation5 + $0x108] sm:$0xff] }
  0x6c   :  { %v783_v38 = vrot.slane %v168_v24, %v4538_v5  ;;  %v4223_v39 = vadd.f32 %v2608_v30, %v64_v26  ;;  %v2625_v40 = vcombine.low %v2617_v27, %v2624_v31  ;;  %v2634_v41 = vrot.slane %v2626_v32, %v4554_v14 }
  0x6d   :  { %v2643_v42 = vcombine.low %v767_v29, %v771_v33  ;;  %v2641_v43 = vrot.slane %v2627_v35, %v4554_v14  ;;  %v2644_v44 = vcombine.low %v775_v36, %v779_v37  ;;  %v787_v45 = vrot.slane %v168_v24, %v4540_v6 }
  0x6e   :  { %v791_v46 = vrot.slane %v168_v24, %v4542_v7  ;;  %4339 = vst [vmem:[#allocation7 + $0xe0] sm:$0xff] %v4223_v39  ;;  %v4224_v48 = vadd.f32 %v2625_v40, %v65_v34  ;;  %v795_v51 = vrot.slane %v168_v24, %v4544_v8  ;;  %v799_v52 = vrot.slane %v168_v24, %v4546_v9  ;;  %v70_v40 = vld [vmem:[#allocation5 + $0x110] sm:$0xff] }
  0x6f   :  { %v2651_v50 = vrot.slane %v2643_v42, %v4554_v14  ;;  %v2642_v53 = vcombine.low %v2634_v41, %v2641_v43  ;;  %v2658_v54 = vrot.slane %v2644_v44, %v4554_v14  ;;  %v2660_v55 = vcombine.low %v783_v38, %v787_v45  ;;  %v171_v38 = vld [vmem:[#allocation2 + $0x98] sm:$0xff] }
  0x70   :  { %v803_v56 = vrot.slane %v168_v24, %v4548_v10  ;;  %4340 = vst [vmem:[#allocation7 + $0xe8] sm:$0xff] %v4224_v48  ;;  %v2661_v58 = vcombine.low %v791_v46, %v795_v51  ;;  %v807_v59 = vrot.slane %v168_v24, %v4550_v11  ;;  %v811_v60 = vrot.slane %v168_v24, %v4552_v12  ;;  %v71_v48 = vld [vmem:[#allocation5 + $0x118] sm:$0xff] }
  0x71   :  { %v815_v61 = vrot.slane %v169_v47, %v4538_v5  ;;  %v4225_v62 = vadd.f32 %v2642_v53, %v66_v49  ;;  %v2659_v63 = vcombine.low %v2651_v50, %v2658_v54  ;;  %v2668_v0 = vrot.slane %v2660_v55, %v4554_v14 }
  0x72   :  { %v2677_v1 = vcombine.low %v799_v52, %v803_v56  ;;  %v2675_v2 = vrot.slane %v2661_v58, %v4554_v14  ;;  %v2678_v3 = vcombine.low %v807_v59, %v811_v60  ;;  %v819_v4 = vrot.slane %v169_v47, %v4540_v6 }
  0x73   :  { %v823_v13 = vrot.slane %v169_v47, %v4542_v7  ;;  %4341 = vst [vmem:[#allocation7 + $0xf0] sm:$0xff] %v4225_v62  ;;  %v4226_v16 = vadd.f32 %v2659_v63, %v67_v57  ;;  %v827_v19 = vrot.slane %v169_v47, %v4544_v8  ;;  %v831_v20 = vrot.slane %v169_v47, %v4546_v9  ;;  %v72_v63 = vld [vmem:[#allocation5 + $0x120] sm:$0xff] }
  0x74   :  { %v2685_v18 = vrot.slane %v2677_v1, %v4554_v14  ;;  %v2676_v21 = vcombine.low %v2668_v0, %v2675_v2  ;;  %v2692_v22 = vrot.slane %v2678_v3, %v4554_v14  ;;  %v2694_v23 = vcombine.low %v815_v61, %v819_v4  ;;  %v172_v61 = vld [vmem:[#allocation2 + $0xa0] sm:$0xff] }
  0x75   :  { %v835_v24 = vrot.slane %v169_v47, %v4548_v10  ;;  %4342 = vst [vmem:[#allocation7 + $0xf8] sm:$0xff] %v4226_v16  ;;  %v2695_v26 = vcombine.low %v823_v13, %v827_v19  ;;  %v839_v27 = vrot.slane %v169_v47, %v4550_v11  ;;  %v843_v28 = vrot.slane %v169_v47, %v4552_v12  ;;  %v73_v16 = vld [vmem:[#allocation5 + $0x128] sm:$0xff] }
  0x76   :  { %v847_v29 = vrot.slane %v170_v15, %v4538_v5  ;;  %v4227_v30 = vadd.f32 %v2676_v21, %v68_v17  ;;  %v2693_v31 = vcombine.low %v2685_v18, %v2692_v22  ;;  %v2702_v32 = vrot.slane %v2694_v23, %v4554_v14 }
  0x77   :  { %v2711_v33 = vcombine.low %v831_v20, %v835_v24  ;;  %v2709_v34 = vrot.slane %v2695_v26, %v4554_v14  ;;  %v2712_v35 = vcombine.low %v839_v27, %v843_v28  ;;  %v851_v36 = vrot.slane %v170_v15, %v4540_v6 }
  0x78   :  { %v855_v37 = vrot.slane %v170_v15, %v4542_v7  ;;  %4343 = vst [vmem:[#allocation7 + $0x100] sm:$0xff] %v4227_v30  ;;  %v4228_v39 = vadd.f32 %v2693_v31, %v69_v25  ;;  %v859_v42 = vrot.slane %v170_v15, %v4544_v8  ;;  %v863_v43 = vrot.slane %v170_v15, %v4546_v9  ;;  %v74_v31 = vld [vmem:[#allocation5 + $0x130] sm:$0xff] }
  0x79   :  { %v2719_v41 = vrot.slane %v2711_v33, %v4554_v14  ;;  %v2710_v44 = vcombine.low %v2702_v32, %v2709_v34  ;;  %v2726_v45 = vrot.slane %v2712_v35, %v4554_v14  ;;  %v2728_v46 = vcombine.low %v847_v29, %v851_v36  ;;  %v173_v29 = vld [vmem:[#allocation2 + $0xa8] sm:$0xff] }
  0x7a   :  { %v867_v47 = vrot.slane %v170_v15, %v4548_v10  ;;  %4344 = vst [vmem:[#allocation7 + $0x108] sm:$0xff] %v4228_v39  ;;  %v2729_v49 = vcombine.low %v855_v37, %v859_v42  ;;  %v871_v50 = vrot.slane %v170_v15, %v4550_v11  ;;  %v875_v51 = vrot.slane %v170_v15, %v4552_v12  ;;  %v75_v39 = vld [vmem:[#allocation5 + $0x138] sm:$0xff] }
  0x7b   :  { %v879_v52 = vrot.slane %v171_v38, %v4538_v5  ;;  %v4229_v53 = vadd.f32 %v2710_v44, %v70_v40  ;;  %v2727_v54 = vcombine.low %v2719_v41, %v2726_v45  ;;  %v2736_v55 = vrot.slane %v2728_v46, %v4554_v14 }
  0x7c   :  { %v2745_v56 = vcombine.low %v863_v43, %v867_v47  ;;  %v2743_v57 = vrot.slane %v2729_v49, %v4554_v14  ;;  %v2746_v58 = vcombine.low %v871_v50, %v875_v51  ;;  %v883_v59 = vrot.slane %v171_v38, %v4540_v6 }
  0x7d   :  { %v887_v60 = vrot.slane %v171_v38, %v4542_v7  ;;  %4345 = vst [vmem:[#allocation7 + $0x110] sm:$0xff] %v4229_v53  ;;  %v4230_v62 = vadd.f32 %v2727_v54, %v71_v48  ;;  %v891_v1 = vrot.slane %v171_v38, %v4544_v8  ;;  %v895_v2 = vrot.slane %v171_v38, %v4546_v9  ;;  %v76_v54 = vld [vmem:[#allocation5 + $0x140] sm:$0xff] }
  0x7e   :  { %v2753_v0 = vrot.slane %v2745_v56, %v4554_v14  ;;  %v2744_v3 = vcombine.low %v2736_v55, %v2743_v57  ;;  %v2760_v4 = vrot.slane %v2746_v58, %v4554_v14  ;;  %v2762_v13 = vcombine.low %v879_v52, %v883_v59  ;;  %v174_v52 = vld [vmem:[#allocation2 + $0xb0] sm:$0xff] }
  0x7f   :  { %v899_v15 = vrot.slane %v171_v38, %v4548_v10  ;;  %4346 = vst [vmem:[#allocation7 + $0x118] sm:$0xff] %v4230_v62  ;;  %v2763_v17 = vcombine.low %v887_v60, %v891_v1  ;;  %v903_v18 = vrot.slane %v171_v38, %v4550_v11  ;;  %v907_v19 = vrot.slane %v171_v38, %v4552_v12  ;;  %v77_v62 = vld [vmem:[#allocation5 + $0x148] sm:$0xff] }
  0x80   :  { %v911_v20 = vrot.slane %v172_v61, %v4538_v5  ;;  %v4231_v21 = vadd.f32 %v2744_v3, %v72_v63  ;;  %v2761_v22 = vcombine.low %v2753_v0, %v2760_v4  ;;  %v2770_v23 = vrot.slane %v2762_v13, %v4554_v14 }
  0x81   :  { %v2779_v24 = vcombine.low %v895_v2, %v899_v15  ;;  %v2777_v25 = vrot.slane %v2763_v17, %v4554_v14  ;;  %v2780_v26 = vcombine.low %v903_v18, %v907_v19  ;;  %v915_v27 = vrot.slane %v172_v61, %v4540_v6 }
  0x82   :  { %v919_v28 = vrot.slane %v172_v61, %v4542_v7  ;;  %4347 = vst [vmem:[#allocation7 + $0x120] sm:$0xff] %v4231_v21  ;;  %v4232_v30 = vadd.f32 %v2761_v22, %v73_v16  ;;  %v923_v33 = vrot.slane %v172_v61, %v4544_v8  ;;  %v927_v34 = vrot.slane %v172_v61, %v4546_v9  ;;  %v78_v22 = vld [vmem:[#allocation5 + $0x150] sm:$0xff] }
  0x83   :  { %v2787_v32 = vrot.slane %v2779_v24, %v4554_v14  ;;  %v2778_v35 = vcombine.low %v2770_v23, %v2777_v25  ;;  %v2794_v36 = vrot.slane %v2780_v26, %v4554_v14  ;;  %v2796_v37 = vcombine.low %v911_v20, %v915_v27  ;;  %v175_v20 = vld [vmem:[#allocation2 + $0xb8] sm:$0xff] }
  0x84   :  { %v931_v38 = vrot.slane %v172_v61, %v4548_v10  ;;  %4348 = vst [vmem:[#allocation7 + $0x128] sm:$0xff] %v4232_v30  ;;  %v2797_v40 = vcombine.low %v919_v28, %v923_v33  ;;  %v935_v41 = vrot.slane %v172_v61, %v4550_v11  ;;  %v939_v42 = vrot.slane %v172_v61, %v4552_v12  ;;  %v79_v30 = vld [vmem:[#allocation5 + $0x158] sm:$0xff] }
  0x85   :  { %v943_v43 = vrot.slane %v173_v29, %v4538_v5  ;;  %v4233_v44 = vadd.f32 %v2778_v35, %v74_v31  ;;  %v2795_v45 = vcombine.low %v2787_v32, %v2794_v36  ;;  %v2804_v46 = vrot.slane %v2796_v37, %v4554_v14 }
  0x86   :  { %v2813_v47 = vcombine.low %v927_v34, %v931_v38  ;;  %v2811_v48 = vrot.slane %v2797_v40, %v4554_v14  ;;  %v2814_v49 = vcombine.low %v935_v41, %v939_v42  ;;  %v947_v50 = vrot.slane %v173_v29, %v4540_v6 }
  0x87   :  { %v951_v51 = vrot.slane %v173_v29, %v4542_v7  ;;  %4349 = vst [vmem:[#allocation7 + $0x130] sm:$0xff] %v4233_v44  ;;  %v4234_v53 = vadd.f32 %v2795_v45, %v75_v39  ;;  %v955_v56 = vrot.slane %v173_v29, %v4544_v8  ;;  %v959_v57 = vrot.slane %v173_v29, %v4546_v9  ;;  %v80_v45 = vld [vmem:[#allocation5 + $0x160] sm:$0xff] }
  0x88   :  { %v2821_v55 = vrot.slane %v2813_v47, %v4554_v14  ;;  %v2812_v58 = vcombine.low %v2804_v46, %v2811_v48  ;;  %v2828_v59 = vrot.slane %v2814_v49, %v4554_v14  ;;  %v2830_v60 = vcombine.low %v943_v43, %v947_v50  ;;  %v176_v43 = vld [vmem:[#allocation2 + $0xc0] sm:$0xff] }
  0x89   :  { %v963_v61 = vrot.slane %v173_v29, %v4548_v10  ;;  %4350 = vst [vmem:[#allocation7 + $0x138] sm:$0xff] %v4234_v53  ;;  %v2831_v63 = vcombine.low %v951_v51, %v955_v56  ;;  %v967_v0 = vrot.slane %v173_v29, %v4550_v11  ;;  %v971_v1 = vrot.slane %v173_v29, %v4552_v12  ;;  %v81_v53 = vld [vmem:[#allocation5 + $0x168] sm:$0xff] }
  0x8a   :  { %v975_v2 = vrot.slane %v174_v52, %v4538_v5  ;;  %v4235_v3 = vadd.f32 %v2812_v58, %v76_v54  ;;  %v2829_v4 = vcombine.low %v2821_v55, %v2828_v59  ;;  %v2838_v13 = vrot.slane %v2830_v60, %v4554_v14 }
  0x8b   :  { %v2847_v15 = vcombine.low %v959_v57, %v963_v61  ;;  %v2845_v16 = vrot.slane %v2831_v63, %v4554_v14  ;;  %v2848_v17 = vcombine.low %v967_v0, %v971_v1  ;;  %v979_v18 = vrot.slane %v174_v52, %v4540_v6 }
  0x8c   :  { %v983_v19 = vrot.slane %v174_v52, %v4542_v7  ;;  %4351 = vst [vmem:[#allocation7 + $0x140] sm:$0xff] %v4235_v3  ;;  %v4236_v21 = vadd.f32 %v2829_v4, %v77_v62  ;;  %v987_v24 = vrot.slane %v174_v52, %v4544_v8  ;;  %v991_v25 = vrot.slane %v174_v52, %v4546_v9  ;;  %v82_v4 = vld [vmem:[#allocation5 + $0x170] sm:$0xff] }
  0x8d   :  { %v2855_v23 = vrot.slane %v2847_v15, %v4554_v14  ;;  %v2846_v26 = vcombine.low %v2838_v13, %v2845_v16  ;;  %v2862_v27 = vrot.slane %v2848_v17, %v4554_v14  ;;  %v2864_v28 = vcombine.low %v975_v2, %v979_v18  ;;  %v177_v2 = vld [vmem:[#allocation2 + $0xc8] sm:$0xff] }
  0x8e   :  { %v995_v29 = vrot.slane %v174_v52, %v4548_v10  ;;  %4352 = vst [vmem:[#allocation7 + $0x148] sm:$0xff] %v4236_v21  ;;  %v2865_v31 = vcombine.low %v983_v19, %v987_v24  ;;  %v999_v32 = vrot.slane %v174_v52, %v4550_v11  ;;  %v1003_v33 = vrot.slane %v174_v52, %v4552_v12  ;;  %v83_v21 = vld [vmem:[#allocation5 + $0x178] sm:$0xff] }
  0x8f   :  { %v1007_v34 = vrot.slane %v175_v20, %v4538_v5  ;;  %v4237_v35 = vadd.f32 %v2846_v26, %v78_v22  ;;  %v2863_v36 = vcombine.low %v2855_v23, %v2862_v27  ;;  %v2872_v37 = vrot.slane %v2864_v28, %v4554_v14 }
  0x90   :  { %v2881_v38 = vcombine.low %v991_v25, %v995_v29  ;;  %v2879_v39 = vrot.slane %v2865_v31, %v4554_v14  ;;  %v2882_v40 = vcombine.low %v999_v32, %v1003_v33  ;;  %v1011_v41 = vrot.slane %v175_v20, %v4540_v6 }
  0x91   :  { %v1015_v42 = vrot.slane %v175_v20, %v4542_v7  ;;  %4353 = vst [vmem:[#allocation7 + $0x150] sm:$0xff] %v4237_v35  ;;  %v4238_v44 = vadd.f32 %v2863_v36, %v79_v30  ;;  %v1019_v47 = vrot.slane %v175_v20, %v4544_v8  ;;  %v1023_v48 = vrot.slane %v175_v20, %v4546_v9  ;;  %v84_v36 = vld [vmem:[#allocation5 + $0x180] sm:$0xff] }
  0x92   :  { %v2889_v46 = vrot.slane %v2881_v38, %v4554_v14  ;;  %v2880_v49 = vcombine.low %v2872_v37, %v2879_v39  ;;  %v2896_v50 = vrot.slane %v2882_v40, %v4554_v14  ;;  %v2898_v51 = vcombine.low %v1007_v34, %v1011_v41  ;;  %v178_v34 = vld [vmem:[#allocation2 + $0xd0] sm:$0xff] }
  0x93   :  { %v1027_v52 = vrot.slane %v175_v20, %v4548_v10  ;;  %4354 = vst [vmem:[#allocation7 + $0x158] sm:$0xff] %v4238_v44  ;;  %v2899_v54 = vcombine.low %v1015_v42, %v1019_v47  ;;  %v1031_v55 = vrot.slane %v175_v20, %v4550_v11  ;;  %v1035_v56 = vrot.slane %v175_v20, %v4552_v12  ;;  %v85_v44 = vld [vmem:[#allocation5 + $0x188] sm:$0xff] }
  0x94   :  { %v1039_v57 = vrot.slane %v176_v43, %v4538_v5  ;;  %v4239_v58 = vadd.f32 %v2880_v49, %v80_v45  ;;  %v2897_v59 = vcombine.low %v2889_v46, %v2896_v50  ;;  %v2906_v60 = vrot.slane %v2898_v51, %v4554_v14 }
  0x95   :  { %v2915_v61 = vcombine.low %v1023_v48, %v1027_v52  ;;  %v2913_v62 = vrot.slane %v2899_v54, %v4554_v14  ;;  %v2916_v63 = vcombine.low %v1031_v55, %v1035_v56  ;;  %v1043_v0 = vrot.slane %v176_v43, %v4540_v6 }
  0x96   :  { %v1047_v1 = vrot.slane %v176_v43, %v4542_v7  ;;  %4355 = vst [vmem:[#allocation7 + $0x160] sm:$0xff] %v4239_v58  ;;  %v4240_v3 = vadd.f32 %v2897_v59, %v81_v53  ;;  %v1051_v15 = vrot.slane %v176_v43, %v4544_v8  ;;  %v1055_v16 = vrot.slane %v176_v43, %v4546_v9  ;;  %v86_v59 = vld [vmem:[#allocation5 + $0x190] sm:$0xff] }
  0x97   :  { %v2923_v13 = vrot.slane %v2915_v61, %v4554_v14  ;;  %v2914_v17 = vcombine.low %v2906_v60, %v2913_v62  ;;  %v2930_v18 = vrot.slane %v2916_v63, %v4554_v14  ;;  %v2932_v19 = vcombine.low %v1039_v57, %v1043_v0  ;;  %v179_v57 = vld [vmem:[#allocation2 + $0xd8] sm:$0xff] }
  0x98   :  { %v1059_v20 = vrot.slane %v176_v43, %v4548_v10  ;;  %4356 = vst [vmem:[#allocation7 + $0x168] sm:$0xff] %v4240_v3  ;;  %v2933_v22 = vcombine.low %v1047_v1, %v1051_v15  ;;  %v1063_v23 = vrot.slane %v176_v43, %v4550_v11  ;;  %v1067_v24 = vrot.slane %v176_v43, %v4552_v12  ;;  %v87_v3 = vld [vmem:[#allocation5 + $0x198] sm:$0xff] }
  0x99   :  { %v1071_v25 = vrot.slane %v177_v2, %v4538_v5  ;;  %v4241_v26 = vadd.f32 %v2914_v17, %v82_v4  ;;  %v2931_v27 = vcombine.low %v2923_v13, %v2930_v18  ;;  %v2940_v28 = vrot.slane %v2932_v19, %v4554_v14 }
  0x9a   :  { %v2949_v29 = vcombine.low %v1055_v16, %v1059_v20  ;;  %v2947_v30 = vrot.slane %v2933_v22, %v4554_v14  ;;  %v2950_v31 = vcombine.low %v1063_v23, %v1067_v24  ;;  %v1075_v32 = vrot.slane %v177_v2, %v4540_v6 }
  0x9b   :  { %v1079_v33 = vrot.slane %v177_v2, %v4542_v7  ;;  %4357 = vst [vmem:[#allocation7 + $0x170] sm:$0xff] %v4241_v26  ;;  %v4242_v35 = vadd.f32 %v2931_v27, %v83_v21  ;;  %v1083_v38 = vrot.slane %v177_v2, %v4544_v8  ;;  %v1087_v39 = vrot.slane %v177_v2, %v4546_v9  ;;  %v88_v27 = vld [vmem:[#allocation5 + $0x1a0] sm:$0xff] }
  0x9c   :  { %v2957_v37 = vrot.slane %v2949_v29, %v4554_v14  ;;  %v2948_v40 = vcombine.low %v2940_v28, %v2947_v30  ;;  %v2964_v41 = vrot.slane %v2950_v31, %v4554_v14  ;;  %v2966_v42 = vcombine.low %v1071_v25, %v1075_v32  ;;  %v180_v25 = vld [vmem:[#allocation2 + $0xe0] sm:$0xff] }
  0x9d   :  { %v1091_v43 = vrot.slane %v177_v2, %v4548_v10  ;;  %4358 = vst [vmem:[#allocation7 + $0x178] sm:$0xff] %v4242_v35  ;;  %v2967_v45 = vcombine.low %v1079_v33, %v1083_v38  ;;  %v1095_v46 = vrot.slane %v177_v2, %v4550_v11  ;;  %v1099_v47 = vrot.slane %v177_v2, %v4552_v12  ;;  %v89_v35 = vld [vmem:[#allocation5 + $0x1a8] sm:$0xff] }
  0x9e   :  { %v1103_v48 = vrot.slane %v178_v34, %v4538_v5  ;;  %v4243_v49 = vadd.f32 %v2948_v40, %v84_v36  ;;  %v2965_v50 = vcombine.low %v2957_v37, %v2964_v41  ;;  %v2974_v51 = vrot.slane %v2966_v42, %v4554_v14 }
  0x9f   :  { %v2983_v52 = vcombine.low %v1087_v39, %v1091_v43  ;;  %v2981_v53 = vrot.slane %v2967_v45, %v4554_v14  ;;  %v2984_v54 = vcombine.low %v1095_v46, %v1099_v47  ;;  %v1107_v55 = vrot.slane %v178_v34, %v4540_v6 }
  0xa0   :  { %v1111_v56 = vrot.slane %v178_v34, %v4542_v7  ;;  %4359 = vst [vmem:[#allocation7 + $0x180] sm:$0xff] %v4243_v49  ;;  %v4244_v58 = vadd.f32 %v2965_v50, %v85_v44  ;;  %v1115_v61 = vrot.slane %v178_v34, %v4544_v8  ;;  %v1119_v62 = vrot.slane %v178_v34, %v4546_v9  ;;  %v90_v50 = vld [vmem:[#allocation5 + $0x1b0] sm:$0xff] }
  0xa1   :  { %v2991_v60 = vrot.slane %v2983_v52, %v4554_v14  ;;  %v2982_v63 = vcombine.low %v2974_v51, %v2981_v53  ;;  %v2998_v0 = vrot.slane %v2984_v54, %v4554_v14  ;;  %v3000_v1 = vcombine.low %v1103_v48, %v1107_v55  ;;  %v181_v48 = vld [vmem:[#allocation2 + $0xe8] sm:$0xff] }
  0xa2   :  { %v1123_v2 = vrot.slane %v178_v34, %v4548_v10  ;;  %4360 = vst [vmem:[#allocation7 + $0x188] sm:$0xff] %v4244_v58  ;;  %v3001_v4 = vcombine.low %v1111_v56, %v1115_v61  ;;  %v1127_v13 = vrot.slane %v178_v34, %v4550_v11  ;;  %v1131_v15 = vrot.slane %v178_v34, %v4552_v12  ;;  %v91_v58 = vld [vmem:[#allocation5 + $0x1b8] sm:$0xff] }
  0xa3   :  { %v1135_v16 = vrot.slane %v179_v57, %v4538_v5  ;;  %v4245_v17 = vadd.f32 %v2982_v63, %v86_v59  ;;  %v2999_v18 = vcombine.low %v2991_v60, %v2998_v0  ;;  %v3008_v19 = vrot.slane %v3000_v1, %v4554_v14 }
  0xa4   :  { %v3017_v20 = vcombine.low %v1119_v62, %v1123_v2  ;;  %v3015_v21 = vrot.slane %v3001_v4, %v4554_v14  ;;  %v3018_v22 = vcombine.low %v1127_v13, %v1131_v15  ;;  %v1139_v23 = vrot.slane %v179_v57, %v4540_v6 }
  0xa5   :  { %v1143_v24 = vrot.slane %v179_v57, %v4542_v7  ;;  %4361 = vst [vmem:[#allocation7 + $0x190] sm:$0xff] %v4245_v17  ;;  %v4246_v26 = vadd.f32 %v2999_v18, %v87_v3  ;;  %v1147_v29 = vrot.slane %v179_v57, %v4544_v8  ;;  %v1151_v30 = vrot.slane %v179_v57, %v4546_v9  ;;  %v92_v18 = vld [vmem:[#allocation5 + $0x1c0] sm:$0xff] }
  0xa6   :  { %v3025_v28 = vrot.slane %v3017_v20, %v4554_v14  ;;  %v3016_v31 = vcombine.low %v3008_v19, %v3015_v21  ;;  %v3032_v32 = vrot.slane %v3018_v22, %v4554_v14  ;;  %v3034_v33 = vcombine.low %v1135_v16, %v1139_v23  ;;  %v182_v16 = vld [vmem:[#allocation2 + $0xf0] sm:$0xff] }
  0xa7   :  { %v1155_v34 = vrot.slane %v179_v57, %v4548_v10  ;;  %4362 = vst [vmem:[#allocation7 + $0x198] sm:$0xff] %v4246_v26  ;;  %v3035_v36 = vcombine.low %v1143_v24, %v1147_v29  ;;  %v1159_v37 = vrot.slane %v179_v57, %v4550_v11  ;;  %v1163_v38 = vrot.slane %v179_v57, %v4552_v12  ;;  %v93_v26 = vld [vmem:[#allocation5 + $0x1c8] sm:$0xff] }
  0xa8   :  { %v1167_v39 = vrot.slane %v180_v25, %v4538_v5  ;;  %v4247_v40 = vadd.f32 %v3016_v31, %v88_v27  ;;  %v3033_v41 = vcombine.low %v3025_v28, %v3032_v32  ;;  %v3042_v42 = vrot.slane %v3034_v33, %v4554_v14 }
  0xa9   :  { %v3051_v43 = vcombine.low %v1151_v30, %v1155_v34  ;;  %v3049_v44 = vrot.slane %v3035_v36, %v4554_v14  ;;  %v3052_v45 = vcombine.low %v1159_v37, %v1163_v38  ;;  %v1171_v46 = vrot.slane %v180_v25, %v4540_v6 }
  0xaa   :  { %v1175_v47 = vrot.slane %v180_v25, %v4542_v7  ;;  %4363 = vst [vmem:[#allocation7 + $0x1a0] sm:$0xff] %v4247_v40  ;;  %v4248_v49 = vadd.f32 %v3033_v41, %v89_v35  ;;  %v1179_v52 = vrot.slane %v180_v25, %v4544_v8  ;;  %v1183_v53 = vrot.slane %v180_v25, %v4546_v9  ;;  %v94_v41 = vld [vmem:[#allocation5 + $0x1d0] sm:$0xff] }
  0xab   :  { %v3059_v51 = vrot.slane %v3051_v43, %v4554_v14  ;;  %v3050_v54 = vcombine.low %v3042_v42, %v3049_v44  ;;  %v3066_v55 = vrot.slane %v3052_v45, %v4554_v14  ;;  %v3068_v56 = vcombine.low %v1167_v39, %v1171_v46  ;;  %v183_v39 = vld [vmem:[#allocation2 + $0xf8] sm:$0xff] }
  0xac   :  { %v1187_v57 = vrot.slane %v180_v25, %v4548_v10  ;;  %4364 = vst [vmem:[#allocation7 + $0x1a8] sm:$0xff] %v4248_v49  ;;  %v3069_v59 = vcombine.low %v1175_v47, %v1179_v52  ;;  %v1191_v60 = vrot.slane %v180_v25, %v4550_v11  ;;  %v1195_v61 = vrot.slane %v180_v25, %v4552_v12  ;;  %v95_v49 = vld [vmem:[#allocation5 + $0x1d8] sm:$0xff] }
  0xad   :  { %v1199_v62 = vrot.slane %v181_v48, %v4538_v5  ;;  %v4249_v63 = vadd.f32 %v3050_v54, %v90_v50  ;;  %v3067_v0 = vcombine.low %v3059_v51, %v3066_v55  ;;  %v3076_v1 = vrot.slane %v3068_v56, %v4554_v14 }
  0xae   :  { %v3085_v2 = vcombine.low %v1183_v53, %v1187_v57  ;;  %v3083_v3 = vrot.slane %v3069_v59, %v4554_v14  ;;  %v3086_v4 = vcombine.low %v1191_v60, %v1195_v61  ;;  %v1203_v13 = vrot.slane %v181_v48, %v4540_v6 }
  0xaf   :  { %v1207_v15 = vrot.slane %v181_v48, %v4542_v7  ;;  %4365 = vst [vmem:[#allocation7 + $0x1b0] sm:$0xff] %v4249_v63  ;;  %v4250_v17 = vadd.f32 %v3067_v0, %v91_v58  ;;  %v1211_v20 = vrot.slane %v181_v48, %v4544_v8  ;;  %v1215_v21 = vrot.slane %v181_v48, %v4546_v9  ;;  %v96_v0 = vld [vmem:[#allocation5 + $0x1e0] sm:$0xff] }
  0xb0   :  { %v3093_v19 = vrot.slane %v3085_v2, %v4554_v14  ;;  %v3084_v22 = vcombine.low %v3076_v1, %v3083_v3  ;;  %v3100_v23 = vrot.slane %v3086_v4, %v4554_v14  ;;  %v3102_v24 = vcombine.low %v1199_v62, %v1203_v13  ;;  %v184_v62 = vld [vmem:[#allocation2 + $0x100] sm:$0xff] }
  0xb1   :  { %v1219_v25 = vrot.slane %v181_v48, %v4548_v10  ;;  %4366 = vst [vmem:[#allocation7 + $0x1b8] sm:$0xff] %v4250_v17  ;;  %v3103_v27 = vcombine.low %v1207_v15, %v1211_v20  ;;  %v1223_v28 = vrot.slane %v181_v48, %v4550_v11  ;;  %v1227_v29 = vrot.slane %v181_v48, %v4552_v12  ;;  %v97_v17 = vld [vmem:[#allocation5 + $0x1e8] sm:$0xff] }
  0xb2   :  { %v1231_v30 = vrot.slane %v182_v16, %v4538_v5  ;;  %v4251_v31 = vadd.f32 %v3084_v22, %v92_v18  ;;  %v3101_v32 = vcombine.low %v3093_v19, %v3100_v23  ;;  %v3110_v33 = vrot.slane %v3102_v24, %v4554_v14 }
  0xb3   :  { %v3119_v34 = vcombine.low %v1215_v21, %v1219_v25  ;;  %v3117_v35 = vrot.slane %v3103_v27, %v4554_v14  ;;  %v3120_v36 = vcombine.low %v1223_v28, %v1227_v29  ;;  %v1235_v37 = vrot.slane %v182_v16, %v4540_v6 }
  0xb4   :  { %v1239_v38 = vrot.slane %v182_v16, %v4542_v7  ;;  %4367 = vst [vmem:[#allocation7 + $0x1c0] sm:$0xff] %v4251_v31  ;;  %v4252_v40 = vadd.f32 %v3101_v32, %v93_v26  ;;  %v1243_v43 = vrot.slane %v182_v16, %v4544_v8  ;;  %v1247_v44 = vrot.slane %v182_v16, %v4546_v9  ;;  %v98_v32 = vld [vmem:[#allocation5 + $0x1f0] sm:$0xff] }
  0xb5   :  { %v3127_v42 = vrot.slane %v3119_v34, %v4554_v14  ;;  %v3118_v45 = vcombine.low %v3110_v33, %v3117_v35  ;;  %v3134_v46 = vrot.slane %v3120_v36, %v4554_v14  ;;  %v3136_v47 = vcombine.low %v1231_v30, %v1235_v37  ;;  %v185_v30 = vld [vmem:[#allocation2 + $0x108] sm:$0xff] }
  0xb6   :  { %v1251_v48 = vrot.slane %v182_v16, %v4548_v10  ;;  %4368 = vst [vmem:[#allocation7 + $0x1c8] sm:$0xff] %v4252_v40  ;;  %v3137_v50 = vcombine.low %v1239_v38, %v1243_v43  ;;  %v1255_v51 = vrot.slane %v182_v16, %v4550_v11  ;;  %v1259_v52 = vrot.slane %v182_v16, %v4552_v12  ;;  %v99_v40 = vld [vmem:[#allocation5 + $0x1f8] sm:$0xff] }
  0xb7   :  { %v1263_v53 = vrot.slane %v183_v39, %v4538_v5  ;;  %v4253_v54 = vadd.f32 %v3118_v45, %v94_v41  ;;  %v3135_v55 = vcombine.low %v3127_v42, %v3134_v46  ;;  %v3144_v56 = vrot.slane %v3136_v47, %v4554_v14 }
  0xb8   :  { %v3153_v57 = vcombine.low %v1247_v44, %v1251_v48  ;;  %v3151_v58 = vrot.slane %v3137_v50, %v4554_v14  ;;  %v3154_v59 = vcombine.low %v1255_v51, %v1259_v52  ;;  %v1267_v60 = vrot.slane %v183_v39, %v4540_v6 }
  0xb9   :  { %v1271_v61 = vrot.slane %v183_v39, %v4542_v7  ;;  %4369 = vst [vmem:[#allocation7 + $0x1d0] sm:$0xff] %v4253_v54  ;;  %v4254_v63 = vadd.f32 %v3135_v55, %v95_v49  ;;  %v1275_v2 = vrot.slane %v183_v39, %v4544_v8  ;;  %v1279_v3 = vrot.slane %v183_v39, %v4546_v9  ;;  %v100_v55 = vld [vmem:[#allocation5 + $0x200] sm:$0xff] }
  0xba   :  { %v3161_v1 = vrot.slane %v3153_v57, %v4554_v14  ;;  %v3152_v4 = vcombine.low %v3144_v56, %v3151_v58  ;;  %v3168_v13 = vrot.slane %v3154_v59, %v4554_v14  ;;  %v3170_v15 = vcombine.low %v1263_v53, %v1267_v60  ;;  %v186_v53 = vld [vmem:[#allocation2 + $0x110] sm:$0xff] }
  0xbb   :  { %v1283_v16 = vrot.slane %v183_v39, %v4548_v10  ;;  %4370 = vst [vmem:[#allocation7 + $0x1d8] sm:$0xff] %v4254_v63  ;;  %v3171_v18 = vcombine.low %v1271_v61, %v1275_v2  ;;  %v1287_v19 = vrot.slane %v183_v39, %v4550_v11  ;;  %v1291_v20 = vrot.slane %v183_v39, %v4552_v12  ;;  %v101_v63 = vld [vmem:[#allocation5 + $0x208] sm:$0xff] }
  0xbc   :  { %v1295_v21 = vrot.slane %v184_v62, %v4538_v5  ;;  %v4255_v22 = vadd.f32 %v3152_v4, %v96_v0  ;;  %v3169_v23 = vcombine.low %v3161_v1, %v3168_v13  ;;  %v3178_v24 = vrot.slane %v3170_v15, %v4554_v14 }
  0xbd   :  { %v3187_v25 = vcombine.low %v1279_v3, %v1283_v16  ;;  %v3185_v26 = vrot.slane %v3171_v18, %v4554_v14  ;;  %v3188_v27 = vcombine.low %v1287_v19, %v1291_v20  ;;  %v1299_v28 = vrot.slane %v184_v62, %v4540_v6 }
  0xbe   :  { %v1303_v29 = vrot.slane %v184_v62, %v4542_v7  ;;  %4371 = vst [vmem:[#allocation7 + $0x1e0] sm:$0xff] %v4255_v22  ;;  %v4256_v31 = vadd.f32 %v3169_v23, %v97_v17  ;;  %v1307_v34 = vrot.slane %v184_v62, %v4544_v8  ;;  %v1311_v35 = vrot.slane %v184_v62, %v4546_v9  ;;  %v102_v23 = vld [vmem:[#allocation5 + $0x210] sm:$0xff] }
  0xbf   :  { %v3195_v33 = vrot.slane %v3187_v25, %v4554_v14  ;;  %v3186_v36 = vcombine.low %v3178_v24, %v3185_v26  ;;  %v3202_v37 = vrot.slane %v3188_v27, %v4554_v14  ;;  %v3204_v38 = vcombine.low %v1295_v21, %v1299_v28  ;;  %v187_v21 = vld [vmem:[#allocation2 + $0x118] sm:$0xff] }
  0xc0   :  { %v1315_v39 = vrot.slane %v184_v62, %v4548_v10  ;;  %4372 = vst [vmem:[#allocation7 + $0x1e8] sm:$0xff] %v4256_v31  ;;  %v3205_v41 = vcombine.low %v1303_v29, %v1307_v34  ;;  %v1319_v42 = vrot.slane %v184_v62, %v4550_v11  ;;  %v1323_v43 = vrot.slane %v184_v62, %v4552_v12  ;;  %v103_v31 = vld [vmem:[#allocation5 + $0x218] sm:$0xff] }
  0xc1   :  { %v1327_v44 = vrot.slane %v185_v30, %v4538_v5  ;;  %v4257_v45 = vadd.f32 %v3186_v36, %v98_v32  ;;  %v3203_v46 = vcombine.low %v3195_v33, %v3202_v37  ;;  %v3212_v47 = vrot.slane %v3204_v38, %v4554_v14 }
  0xc2   :  { %v3221_v48 = vcombine.low %v1311_v35, %v1315_v39  ;;  %v3219_v49 = vrot.slane %v3205_v41, %v4554_v14  ;;  %v3222_v50 = vcombine.low %v1319_v42, %v1323_v43  ;;  %v1331_v51 = vrot.slane %v185_v30, %v4540_v6 }
  0xc3   :  { %v1335_v52 = vrot.slane %v185_v30, %v4542_v7  ;;  %4373 = vst [vmem:[#allocation7 + $0x1f0] sm:$0xff] %v4257_v45  ;;  %v4258_v54 = vadd.f32 %v3203_v46, %v99_v40  ;;  %v1339_v57 = vrot.slane %v185_v30, %v4544_v8  ;;  %v1343_v58 = vrot.slane %v185_v30, %v4546_v9  ;;  %v104_v46 = vld [vmem:[#allocation5 + $0x220] sm:$0xff] }
  0xc4   :  { %v3229_v56 = vrot.slane %v3221_v48, %v4554_v14  ;;  %v3220_v59 = vcombine.low %v3212_v47, %v3219_v49  ;;  %v3236_v60 = vrot.slane %v3222_v50, %v4554_v14  ;;  %v3238_v61 = vcombine.low %v1327_v44, %v1331_v51  ;;  %v188_v44 = vld [vmem:[#allocation2 + $0x120] sm:$0xff] }
  0xc5   :  { %v1347_v62 = vrot.slane %v185_v30, %v4548_v10  ;;  %4374 = vst [vmem:[#allocation7 + $0x1f8] sm:$0xff] %v4258_v54  ;;  %v3239_v0 = vcombine.low %v1335_v52, %v1339_v57  ;;  %v1351_v1 = vrot.slane %v185_v30, %v4550_v11  ;;  %v1355_v2 = vrot.slane %v185_v30, %v4552_v12  ;;  %v105_v54 = vld [vmem:[#allocation5 + $0x228] sm:$0xff] }
  0xc6   :  { %v1359_v3 = vrot.slane %v186_v53, %v4538_v5  ;;  %v4259_v4 = vadd.f32 %v3220_v59, %v100_v55  ;;  %v3237_v13 = vcombine.low %v3229_v56, %v3236_v60  ;;  %v3246_v15 = vrot.slane %v3238_v61, %v4554_v14 }
  0xc7   :  { %v3255_v16 = vcombine.low %v1343_v58, %v1347_v62  ;;  %v3253_v17 = vrot.slane %v3239_v0, %v4554_v14  ;;  %v3256_v18 = vcombine.low %v1351_v1, %v1355_v2  ;;  %v1363_v19 = vrot.slane %v186_v53, %v4540_v6 }
  0xc8   :  { %v1367_v20 = vrot.slane %v186_v53, %v4542_v7  ;;  %4375 = vst [vmem:[#allocation7 + $0x200] sm:$0xff] %v4259_v4  ;;  %v4260_v22 = vadd.f32 %v3237_v13, %v101_v63  ;;  %v1371_v25 = vrot.slane %v186_v53, %v4544_v8  ;;  %v1375_v26 = vrot.slane %v186_v53, %v4546_v9  ;;  %v106_v13 = vld [vmem:[#allocation5 + $0x230] sm:$0xff] }
  0xc9   :  { %v3263_v24 = vrot.slane %v3255_v16, %v4554_v14  ;;  %v3254_v27 = vcombine.low %v3246_v15, %v3253_v17  ;;  %v3270_v28 = vrot.slane %v3256_v18, %v4554_v14  ;;  %v3272_v29 = vcombine.low %v1359_v3, %v1363_v19  ;;  %v189_v3 = vld [vmem:[#allocation2 + $0x128] sm:$0xff] }
  0xca   :  { %v1379_v30 = vrot.slane %v186_v53, %v4548_v10  ;;  %4376 = vst [vmem:[#allocation7 + $0x208] sm:$0xff] %v4260_v22  ;;  %v3273_v32 = vcombine.low %v1367_v20, %v1371_v25  ;;  %v1383_v33 = vrot.slane %v186_v53, %v4550_v11  ;;  %v1387_v34 = vrot.slane %v186_v53, %v4552_v12  ;;  %v107_v22 = vld [vmem:[#allocation5 + $0x238] sm:$0xff] }
  0xcb   :  { %v1391_v35 = vrot.slane %v187_v21, %v4538_v5  ;;  %v4261_v36 = vadd.f32 %v3254_v27, %v102_v23  ;;  %v3271_v37 = vcombine.low %v3263_v24, %v3270_v28  ;;  %v3280_v38 = vrot.slane %v3272_v29, %v4554_v14 }
  0xcc   :  { %v3289_v39 = vcombine.low %v1375_v26, %v1379_v30  ;;  %v3287_v40 = vrot.slane %v3273_v32, %v4554_v14  ;;  %v3290_v41 = vcombine.low %v1383_v33, %v1387_v34  ;;  %v1395_v42 = vrot.slane %v187_v21, %v4540_v6 }
  0xcd   :  { %v1399_v43 = vrot.slane %v187_v21, %v4542_v7  ;;  %4377 = vst [vmem:[#allocation7 + $0x210] sm:$0xff] %v4261_v36  ;;  %v4262_v45 = vadd.f32 %v3271_v37, %v103_v31  ;;  %v1403_v48 = vrot.slane %v187_v21, %v4544_v8  ;;  %v1407_v49 = vrot.slane %v187_v21, %v4546_v9  ;;  %v108_v37 = vld [vmem:[#allocation5 + $0x240] sm:$0xff] }
  0xce   :  { %v3297_v47 = vrot.slane %v3289_v39, %v4554_v14  ;;  %v3288_v50 = vcombine.low %v3280_v38, %v3287_v40  ;;  %v3304_v51 = vrot.slane %v3290_v41, %v4554_v14  ;;  %v3306_v52 = vcombine.low %v1391_v35, %v1395_v42  ;;  %v190_v35 = vld [vmem:[#allocation2 + $0x130] sm:$0xff] }
  0xcf   :  { %v1411_v53 = vrot.slane %v187_v21, %v4548_v10  ;;  %4378 = vst [vmem:[#allocation7 + $0x218] sm:$0xff] %v4262_v45  ;;  %v3307_v55 = vcombine.low %v1399_v43, %v1403_v48  ;;  %v1415_v56 = vrot.slane %v187_v21, %v4550_v11  ;;  %v1419_v57 = vrot.slane %v187_v21, %v4552_v12  ;;  %v109_v45 = vld [vmem:[#allocation5 + $0x248] sm:$0xff] }
  0xd0   :  { %v1423_v58 = vrot.slane %v188_v44, %v4538_v5  ;;  %v4263_v59 = vadd.f32 %v3288_v50, %v104_v46  ;;  %v3305_v60 = vcombine.low %v3297_v47, %v3304_v51  ;;  %v3314_v61 = vrot.slane %v3306_v52, %v4554_v14 }
  0xd1   :  { %v3323_v62 = vcombine.low %v1407_v49, %v1411_v53  ;;  %v3321_v63 = vrot.slane %v3307_v55, %v4554_v14  ;;  %v3324_v0 = vcombine.low %v1415_v56, %v1419_v57  ;;  %v1427_v1 = vrot.slane %v188_v44, %v4540_v6 }
  0xd2   :  { %v1431_v2 = vrot.slane %v188_v44, %v4542_v7  ;;  %4379 = vst [vmem:[#allocation7 + $0x220] sm:$0xff] %v4263_v59  ;;  %v4264_v4 = vadd.f32 %v3305_v60, %v105_v54  ;;  %v1435_v16 = vrot.slane %v188_v44, %v4544_v8  ;;  %v1439_v17 = vrot.slane %v188_v44, %v4546_v9  ;;  %v110_v60 = vld [vmem:[#allocation5 + $0x250] sm:$0xff] }
  0xd3   :  { %v3331_v15 = vrot.slane %v3323_v62, %v4554_v14  ;;  %v3322_v18 = vcombine.low %v3314_v61, %v3321_v63  ;;  %v3338_v19 = vrot.slane %v3324_v0, %v4554_v14  ;;  %v3340_v20 = vcombine.low %v1423_v58, %v1427_v1  ;;  %v191_v58 = vld [vmem:[#allocation2 + $0x138] sm:$0xff] }
  0xd4   :  { %v1443_v21 = vrot.slane %v188_v44, %v4548_v10  ;;  %4380 = vst [vmem:[#allocation7 + $0x228] sm:$0xff] %v4264_v4  ;;  %v3341_v23 = vcombine.low %v1431_v2, %v1435_v16  ;;  %v1447_v24 = vrot.slane %v188_v44, %v4550_v11  ;;  %v1451_v25 = vrot.slane %v188_v44, %v4552_v12  ;;  %v111_v4 = vld [vmem:[#allocation5 + $0x258] sm:$0xff] }
  0xd5   :  { %v1455_v26 = vrot.slane %v189_v3, %v4538_v5  ;;  %v4265_v27 = vadd.f32 %v3322_v18, %v106_v13  ;;  %v3339_v28 = vcombine.low %v3331_v15, %v3338_v19  ;;  %v3348_v29 = vrot.slane %v3340_v20, %v4554_v14 }
  0xd6   :  { %v3357_v30 = vcombine.low %v1439_v17, %v1443_v21  ;;  %v3355_v31 = vrot.slane %v3341_v23, %v4554_v14  ;;  %v3358_v32 = vcombine.low %v1447_v24, %v1451_v25  ;;  %v1459_v33 = vrot.slane %v189_v3, %v4540_v6 }
  0xd7   :  { %v1463_v34 = vrot.slane %v189_v3, %v4542_v7  ;;  %4381 = vst [vmem:[#allocation7 + $0x230] sm:$0xff] %v4265_v27  ;;  %v4266_v36 = vadd.f32 %v3339_v28, %v107_v22  ;;  %v1467_v39 = vrot.slane %v189_v3, %v4544_v8  ;;  %v1471_v40 = vrot.slane %v189_v3, %v4546_v9  ;;  %v112_v28 = vld [vmem:[#allocation5 + $0x260] sm:$0xff] }
  0xd8   :  { %v3365_v38 = vrot.slane %v3357_v30, %v4554_v14  ;;  %v3356_v41 = vcombine.low %v3348_v29, %v3355_v31  ;;  %v3372_v42 = vrot.slane %v3358_v32, %v4554_v14  ;;  %v3374_v43 = vcombine.low %v1455_v26, %v1459_v33  ;;  %v192_v26 = vld [vmem:[#allocation2 + $0x140] sm:$0xff] }
  0xd9   :  { %v1475_v44 = vrot.slane %v189_v3, %v4548_v10  ;;  %4382 = vst [vmem:[#allocation7 + $0x238] sm:$0xff] %v4266_v36  ;;  %v3375_v46 = vcombine.low %v1463_v34, %v1467_v39  ;;  %v1479_v47 = vrot.slane %v189_v3, %v4550_v11  ;;  %v1483_v48 = vrot.slane %v189_v3, %v4552_v12  ;;  %v113_v36 = vld [vmem:[#allocation5 + $0x268] sm:$0xff] }
  0xda   :  { %v1487_v49 = vrot.slane %v190_v35, %v4538_v5  ;;  %v4267_v50 = vadd.f32 %v3356_v41, %v108_v37  ;;  %v3373_v51 = vcombine.low %v3365_v38, %v3372_v42  ;;  %v3382_v52 = vrot.slane %v3374_v43, %v4554_v14 }
  0xdb   :  { %v3391_v53 = vcombine.low %v1471_v40, %v1475_v44  ;;  %v3389_v54 = vrot.slane %v3375_v46, %v4554_v14  ;;  %v3392_v55 = vcombine.low %v1479_v47, %v1483_v48  ;;  %v1491_v56 = vrot.slane %v190_v35, %v4540_v6 }
  0xdc   :  { %v1495_v57 = vrot.slane %v190_v35, %v4542_v7  ;;  %4383 = vst [vmem:[#allocation7 + $0x240] sm:$0xff] %v4267_v50  ;;  %v4268_v59 = vadd.f32 %v3373_v51, %v109_v45  ;;  %v1499_v62 = vrot.slane %v190_v35, %v4544_v8  ;;  %v1503_v63 = vrot.slane %v190_v35, %v4546_v9  ;;  %v114_v51 = vld [vmem:[#allocation5 + $0x270] sm:$0xff] }
  0xdd   :  { %v3399_v61 = vrot.slane %v3391_v53, %v4554_v14  ;;  %v3390_v0 = vcombine.low %v3382_v52, %v3389_v54  ;;  %v3406_v1 = vrot.slane %v3392_v55, %v4554_v14  ;;  %v3408_v2 = vcombine.low %v1487_v49, %v1491_v56  ;;  %v193_v49 = vld [vmem:[#allocation2 + $0x148] sm:$0xff] }
  0xde   :  { %v1507_v3 = vrot.slane %v190_v35, %v4548_v10  ;;  %4384 = vst [vmem:[#allocation7 + $0x248] sm:$0xff] %v4268_v59  ;;  %v3409_v13 = vcombine.low %v1495_v57, %v1499_v62  ;;  %v1511_v15 = vrot.slane %v190_v35, %v4550_v11  ;;  %v1515_v16 = vrot.slane %v190_v35, %v4552_v12  ;;  %v115_v59 = vld [vmem:[#allocation5 + $0x278] sm:$0xff] }
  0xdf   :  { %v1519_v17 = vrot.slane %v191_v58, %v4538_v5  ;;  %v4269_v18 = vadd.f32 %v3390_v0, %v110_v60  ;;  %v3407_v19 = vcombine.low %v3399_v61, %v3406_v1  ;;  %v3416_v20 = vrot.slane %v3408_v2, %v4554_v14 }
  0xe0   :  { %v3425_v21 = vcombine.low %v1503_v63, %v1507_v3  ;;  %v3423_v22 = vrot.slane %v3409_v13, %v4554_v14  ;;  %v3426_v23 = vcombine.low %v1511_v15, %v1515_v16  ;;  %v1523_v24 = vrot.slane %v191_v58, %v4540_v6 }
  0xe1   :  { %v1527_v25 = vrot.slane %v191_v58, %v4542_v7  ;;  %4385 = vst [vmem:[#allocation7 + $0x250] sm:$0xff] %v4269_v18  ;;  %v4270_v27 = vadd.f32 %v3407_v19, %v111_v4  ;;  %v1531_v30 = vrot.slane %v191_v58, %v4544_v8  ;;  %v1535_v31 = vrot.slane %v191_v58, %v4546_v9  ;;  %v116_v19 = vld [vmem:[#allocation5 + $0x280] sm:$0xff] }
  0xe2   :  { %v3433_v29 = vrot.slane %v3425_v21, %v4554_v14  ;;  %v3424_v32 = vcombine.low %v3416_v20, %v3423_v22  ;;  %v3440_v33 = vrot.slane %v3426_v23, %v4554_v14  ;;  %v3442_v34 = vcombine.low %v1519_v17, %v1523_v24  ;;  %v194_v17 = vld [vmem:[#allocation2 + $0x150] sm:$0xff] }
  0xe3   :  { %v1539_v35 = vrot.slane %v191_v58, %v4548_v10  ;;  %4386 = vst [vmem:[#allocation7 + $0x258] sm:$0xff] %v4270_v27  ;;  %v3443_v37 = vcombine.low %v1527_v25, %v1531_v30  ;;  %v1543_v38 = vrot.slane %v191_v58, %v4550_v11  ;;  %v1547_v39 = vrot.slane %v191_v58, %v4552_v12  ;;  %v117_v27 = vld [vmem:[#allocation5 + $0x288] sm:$0xff] }
  0xe4   :  { %v1551_v40 = vrot.slane %v192_v26, %v4538_v5  ;;  %v4271_v41 = vadd.f32 %v3424_v32, %v112_v28  ;;  %v3441_v42 = vcombine.low %v3433_v29, %v3440_v33  ;;  %v3450_v43 = vrot.slane %v3442_v34, %v4554_v14 }
  0xe5   :  { %v3459_v44 = vcombine.low %v1535_v31, %v1539_v35  ;;  %v3457_v45 = vrot.slane %v3443_v37, %v4554_v14  ;;  %v3460_v46 = vcombine.low %v1543_v38, %v1547_v39  ;;  %v1555_v47 = vrot.slane %v192_v26, %v4540_v6 }
  0xe6   :  { %v1559_v48 = vrot.slane %v192_v26, %v4542_v7  ;;  %4387 = vst [vmem:[#allocation7 + $0x260] sm:$0xff] %v4271_v41  ;;  %v4272_v50 = vadd.f32 %v3441_v42, %v113_v36  ;;  %v1563_v53 = vrot.slane %v192_v26, %v4544_v8  ;;  %v1567_v54 = vrot.slane %v192_v26, %v4546_v9  ;;  %v118_v42 = vld [vmem:[#allocation5 + $0x290] sm:$0xff] }
  0xe7   :  { %v3467_v52 = vrot.slane %v3459_v44, %v4554_v14  ;;  %v3458_v55 = vcombine.low %v3450_v43, %v3457_v45  ;;  %v3474_v56 = vrot.slane %v3460_v46, %v4554_v14  ;;  %v3476_v57 = vcombine.low %v1551_v40, %v1555_v47  ;;  %v195_v40 = vld [vmem:[#allocation2 + $0x158] sm:$0xff] }
  0xe8   :  { %v1571_v58 = vrot.slane %v192_v26, %v4548_v10  ;;  %4388 = vst [vmem:[#allocation7 + $0x268] sm:$0xff] %v4272_v50  ;;  %v3477_v60 = vcombine.low %v1559_v48, %v1563_v53  ;;  %v1575_v61 = vrot.slane %v192_v26, %v4550_v11  ;;  %v1579_v62 = vrot.slane %v192_v26, %v4552_v12  ;;  %v119_v50 = vld [vmem:[#allocation5 + $0x298] sm:$0xff] }
  0xe9   :  { %v1583_v63 = vrot.slane %v193_v49, %v4538_v5  ;;  %v4273_v0 = vadd.f32 %v3458_v55, %v114_v51  ;;  %v3475_v1 = vcombine.low %v3467_v52, %v3474_v56  ;;  %v3484_v2 = vrot.slane %v3476_v57, %v4554_v14 }
  0xea   :  { %v3493_v3 = vcombine.low %v1567_v54, %v1571_v58  ;;  %v3491_v4 = vrot.slane %v3477_v60, %v4554_v14  ;;  %v3494_v13 = vcombine.low %v1575_v61, %v1579_v62  ;;  %v1587_v15 = vrot.slane %v193_v49, %v4540_v6 }
  0xeb   :  { %v1591_v16 = vrot.slane %v193_v49, %v4542_v7  ;;  %4389 = vst [vmem:[#allocation7 + $0x270] sm:$0xff] %v4273_v0  ;;  %v4274_v18 = vadd.f32 %v3475_v1, %v115_v59  ;;  %v1595_v21 = vrot.slane %v193_v49, %v4544_v8  ;;  %v1599_v22 = vrot.slane %v193_v49, %v4546_v9  ;;  %v120_v1 = vld [vmem:[#allocation5 + $0x2a0] sm:$0xff] }
  0xec   :  { %v3501_v20 = vrot.slane %v3493_v3, %v4554_v14  ;;  %v3492_v23 = vcombine.low %v3484_v2, %v3491_v4  ;;  %v3508_v24 = vrot.slane %v3494_v13, %v4554_v14  ;;  %v3510_v25 = vcombine.low %v1583_v63, %v1587_v15  ;;  %v196_v63 = vld [vmem:[#allocation2 + $0x160] sm:$0xff] }
  0xed   :  { %v1603_v26 = vrot.slane %v193_v49, %v4548_v10  ;;  %4390 = vst [vmem:[#allocation7 + $0x278] sm:$0xff] %v4274_v18  ;;  %v3511_v28 = vcombine.low %v1591_v16, %v1595_v21  ;;  %v1607_v29 = vrot.slane %v193_v49, %v4550_v11  ;;  %v1611_v30 = vrot.slane %v193_v49, %v4552_v12  ;;  %v121_v18 = vld [vmem:[#allocation5 + $0x2a8] sm:$0xff] }
  0xee   :  { %v1615_v31 = vrot.slane %v194_v17, %v4538_v5  ;;  %v4275_v32 = vadd.f32 %v3492_v23, %v116_v19  ;;  %v3509_v33 = vcombine.low %v3501_v20, %v3508_v24  ;;  %v3518_v34 = vrot.slane %v3510_v25, %v4554_v14 }
  0xef   :  { %v3527_v35 = vcombine.low %v1599_v22, %v1603_v26  ;;  %v3525_v36 = vrot.slane %v3511_v28, %v4554_v14  ;;  %v3528_v37 = vcombine.low %v1607_v29, %v1611_v30  ;;  %v1619_v38 = vrot.slane %v194_v17, %v4540_v6 }
  0xf0   :  { %v1623_v39 = vrot.slane %v194_v17, %v4542_v7  ;;  %4391 = vst [vmem:[#allocation7 + $0x280] sm:$0xff] %v4275_v32  ;;  %v4276_v41 = vadd.f32 %v3509_v33, %v117_v27  ;;  %v1627_v44 = vrot.slane %v194_v17, %v4544_v8  ;;  %v1631_v45 = vrot.slane %v194_v17, %v4546_v9  ;;  %v122_v33 = vld [vmem:[#allocation5 + $0x2b0] sm:$0xff] }
  0xf1   :  { %v3535_v43 = vrot.slane %v3527_v35, %v4554_v14  ;;  %v3526_v46 = vcombine.low %v3518_v34, %v3525_v36  ;;  %v3542_v47 = vrot.slane %v3528_v37, %v4554_v14  ;;  %v3544_v48 = vcombine.low %v1615_v31, %v1619_v38  ;;  %v197_v31 = vld [vmem:[#allocation2 + $0x168] sm:$0xff] }
  0xf2   :  { %v1635_v49 = vrot.slane %v194_v17, %v4548_v10  ;;  %4392 = vst [vmem:[#allocation7 + $0x288] sm:$0xff] %v4276_v41  ;;  %v3545_v51 = vcombine.low %v1623_v39, %v1627_v44  ;;  %v1639_v52 = vrot.slane %v194_v17, %v4550_v11  ;;  %v1643_v53 = vrot.slane %v194_v17, %v4552_v12  ;;  %v123_v41 = vld [vmem:[#allocation5 + $0x2b8] sm:$0xff] }
  0xf3   :  { %v1647_v54 = vrot.slane %v195_v40, %v4538_v5  ;;  %v4277_v55 = vadd.f32 %v3526_v46, %v118_v42  ;;  %v3543_v56 = vcombine.low %v3535_v43, %v3542_v47  ;;  %v3552_v57 = vrot.slane %v3544_v48, %v4554_v14 }
  0xf4   :  { %v3561_v58 = vcombine.low %v1631_v45, %v1635_v49  ;;  %v3559_v59 = vrot.slane %v3545_v51, %v4554_v14  ;;  %v3562_v60 = vcombine.low %v1639_v52, %v1643_v53  ;;  %v1651_v61 = vrot.slane %v195_v40, %v4540_v6 }
  0xf5   :  { %v1655_v62 = vrot.slane %v195_v40, %v4542_v7  ;;  %4393 = vst [vmem:[#allocation7 + $0x290] sm:$0xff] %v4277_v55  ;;  %v4278_v0 = vadd.f32 %v3543_v56, %v119_v50  ;;  %v1659_v3 = vrot.slane %v195_v40, %v4544_v8  ;;  %v1663_v4 = vrot.slane %v195_v40, %v4546_v9  ;;  %v124_v56 = vld [vmem:[#allocation5 + $0x2c0] sm:$0xff] }
  0xf6   :  { %v3569_v2 = vrot.slane %v3561_v58, %v4554_v14  ;;  %v3560_v13 = vcombine.low %v3552_v57, %v3559_v59  ;;  %v3576_v15 = vrot.slane %v3562_v60, %v4554_v14  ;;  %v3578_v16 = vcombine.low %v1647_v54, %v1651_v61  ;;  %v198_v54 = vld [vmem:[#allocation2 + $0x170] sm:$0xff] }
  0xf7   :  { %v1667_v17 = vrot.slane %v195_v40, %v4548_v10  ;;  %4394 = vst [vmem:[#allocation7 + $0x298] sm:$0xff] %v4278_v0  ;;  %v3579_v19 = vcombine.low %v1655_v62, %v1659_v3  ;;  %v1671_v20 = vrot.slane %v195_v40, %v4550_v11  ;;  %v1675_v21 = vrot.slane %v195_v40, %v4552_v12  ;;  %v125_v0 = vld [vmem:[#allocation5 + $0x2c8] sm:$0xff] }
  0xf8   :  { %v1679_v22 = vrot.slane %v196_v63, %v4538_v5  ;;  %v4279_v23 = vadd.f32 %v3560_v13, %v120_v1  ;;  %v3577_v24 = vcombine.low %v3569_v2, %v3576_v15  ;;  %v3586_v25 = vrot.slane %v3578_v16, %v4554_v14 }
  0xf9   :  { %v3595_v26 = vcombine.low %v1663_v4, %v1667_v17  ;;  %v3593_v27 = vrot.slane %v3579_v19, %v4554_v14  ;;  %v3596_v28 = vcombine.low %v1671_v20, %v1675_v21  ;;  %v1683_v29 = vrot.slane %v196_v63, %v4540_v6 }
  0xfa   :  { %v1687_v30 = vrot.slane %v196_v63, %v4542_v7  ;;  %4395 = vst [vmem:[#allocation7 + $0x2a0] sm:$0xff] %v4279_v23  ;;  %v4280_v32 = vadd.f32 %v3577_v24, %v121_v18  ;;  %v1691_v35 = vrot.slane %v196_v63, %v4544_v8  ;;  %v1695_v36 = vrot.slane %v196_v63, %v4546_v9  ;;  %v126_v24 = vld [vmem:[#allocation5 + $0x2d0] sm:$0xff] }
  0xfb   :  { %v3603_v34 = vrot.slane %v3595_v26, %v4554_v14  ;;  %v3594_v37 = vcombine.low %v3586_v25, %v3593_v27  ;;  %v3610_v38 = vrot.slane %v3596_v28, %v4554_v14  ;;  %v3612_v39 = vcombine.low %v1679_v22, %v1683_v29  ;;  %v199_v22 = vld [vmem:[#allocation2 + $0x178] sm:$0xff] }
  0xfc   :  { %v1699_v40 = vrot.slane %v196_v63, %v4548_v10  ;;  %4396 = vst [vmem:[#allocation7 + $0x2a8] sm:$0xff] %v4280_v32  ;;  %v3613_v42 = vcombine.low %v1687_v30, %v1691_v35  ;;  %v1703_v43 = vrot.slane %v196_v63, %v4550_v11  ;;  %v1707_v44 = vrot.slane %v196_v63, %v4552_v12  ;;  %v127_v32 = vld [vmem:[#allocation5 + $0x2d8] sm:$0xff] }
  0xfd   :  { %v1711_v45 = vrot.slane %v197_v31, %v4538_v5  ;;  %v4281_v46 = vadd.f32 %v3594_v37, %v122_v33  ;;  %v3611_v47 = vcombine.low %v3603_v34, %v3610_v38  ;;  %v3620_v48 = vrot.slane %v3612_v39, %v4554_v14 }
  0xfe   :  { %v3629_v49 = vcombine.low %v1695_v36, %v1699_v40  ;;  %v3627_v50 = vrot.slane %v3613_v42, %v4554_v14  ;;  %v3630_v51 = vcombine.low %v1703_v43, %v1707_v44  ;;  %v1715_v52 = vrot.slane %v197_v31, %v4540_v6 }
  0xff   :  { %v1719_v53 = vrot.slane %v197_v31, %v4542_v7  ;;  %4397 = vst [vmem:[#allocation7 + $0x2b0] sm:$0xff] %v4281_v46  ;;  %v4282_v55 = vadd.f32 %v3611_v47, %v123_v41  ;;  %v1723_v58 = vrot.slane %v197_v31, %v4544_v8  ;;  %v1727_v59 = vrot.slane %v197_v31, %v4546_v9  ;;  %v128_v47 = vld [vmem:[#allocation5 + $0x2e0] sm:$0xff] }
 0x100   :  { %v3637_v57 = vrot.slane %v3629_v49, %v4554_v14  ;;  %v3628_v60 = vcombine.low %v3620_v48, %v3627_v50  ;;  %v3644_v61 = vrot.slane %v3630_v51, %v4554_v14  ;;  %v3646_v62 = vcombine.low %v1711_v45, %v1715_v52  ;;  %v200_v45 = vld [vmem:[#allocation2 + $0x180] sm:$0xff] }
 0x101   :  { %v1731_v63 = vrot.slane %v197_v31, %v4548_v10  ;;  %4398 = vst [vmem:[#allocation7 + $0x2b8] sm:$0xff] %v4282_v55  ;;  %v3647_v1 = vcombine.low %v1719_v53, %v1723_v58  ;;  %v1735_v2 = vrot.slane %v197_v31, %v4550_v11  ;;  %v1739_v3 = vrot.slane %v197_v31, %v4552_v12  ;;  %v129_v55 = vld [vmem:[#allocation5 + $0x2e8] sm:$0xff] }
 0x102   :  { %v1743_v4 = vrot.slane %v198_v54, %v4538_v5  ;;  %v4283_v13 = vadd.f32 %v3628_v60, %v124_v56  ;;  %v3645_v15 = vcombine.low %v3637_v57, %v3644_v61  ;;  %v3654_v16 = vrot.slane %v3646_v62, %v4554_v14 }
 0x103   :  { %v3663_v17 = vcombine.low %v1727_v59, %v1731_v63  ;;  %v3661_v18 = vrot.slane %v3647_v1, %v4554_v14  ;;  %v3664_v19 = vcombine.low %v1735_v2, %v1739_v3  ;;  %v1747_v20 = vrot.slane %v198_v54, %v4540_v6 }
 0x104   :  { %v1751_v21 = vrot.slane %v198_v54, %v4542_v7  ;;  %4399 = vst [vmem:[#allocation7 + $0x2c0] sm:$0xff] %v4283_v13  ;;  %v4284_v23 = vadd.f32 %v3645_v15, %v125_v0  ;;  %v1755_v26 = vrot.slane %v198_v54, %v4544_v8  ;;  %v1759_v27 = vrot.slane %v198_v54, %v4546_v9  ;;  %v130_v15 = vld [vmem:[#allocation5 + $0x2f0] sm:$0xff] }
 0x105   :  { %v3671_v25 = vrot.slane %v3663_v17, %v4554_v14  ;;  %v3662_v28 = vcombine.low %v3654_v16, %v3661_v18  ;;  %v3678_v29 = vrot.slane %v3664_v19, %v4554_v14  ;;  %v3680_v30 = vcombine.low %v1743_v4, %v1747_v20  ;;  %v201_v4 = vld [vmem:[#allocation2 + $0x188] sm:$0xff] }
 0x106   :  { %v1763_v31 = vrot.slane %v198_v54, %v4548_v10  ;;  %4400 = vst [vmem:[#allocation7 + $0x2c8] sm:$0xff] %v4284_v23  ;;  %v3681_v33 = vcombine.low %v1751_v21, %v1755_v26  ;;  %v1767_v34 = vrot.slane %v198_v54, %v4550_v11  ;;  %v1771_v35 = vrot.slane %v198_v54, %v4552_v12  ;;  %v131_v23 = vld [vmem:[#allocation5 + $0x2f8] sm:$0xff] }
 0x107   :  { %v1775_v36 = vrot.slane %v199_v22, %v4538_v5  ;;  %v4285_v37 = vadd.f32 %v3662_v28, %v126_v24  ;;  %v3679_v38 = vcombine.low %v3671_v25, %v3678_v29  ;;  %v3688_v39 = vrot.slane %v3680_v30, %v4554_v14 }
 0x108   :  { %v3697_v40 = vcombine.low %v1759_v27, %v1763_v31  ;;  %v3695_v41 = vrot.slane %v3681_v33, %v4554_v14  ;;  %v3698_v42 = vcombine.low %v1767_v34, %v1771_v35  ;;  %v1779_v43 = vrot.slane %v199_v22, %v4540_v6 }
 0x109   :  { %v1783_v44 = vrot.slane %v199_v22, %v4542_v7  ;;  %4401 = vst [vmem:[#allocation7 + $0x2d0] sm:$0xff] %v4285_v37  ;;  %v4286_v46 = vadd.f32 %v3679_v38, %v127_v32  ;;  %v1787_v49 = vrot.slane %v199_v22, %v4544_v8  ;;  %v1791_v50 = vrot.slane %v199_v22, %v4546_v9  ;;  %v132_v38 = vld [vmem:[#allocation5 + $0x300] sm:$0xff] }
 0x10a   :  { %v3705_v48 = vrot.slane %v3697_v40, %v4554_v14  ;;  %v3696_v51 = vcombine.low %v3688_v39, %v3695_v41  ;;  %v3712_v52 = vrot.slane %v3698_v42, %v4554_v14  ;;  %v3714_v53 = vcombine.low %v1775_v36, %v1779_v43  ;;  %v202_v36 = vld [vmem:[#allocation2 + $0x190] sm:$0xff] }
 0x10b   :  { %v1795_v54 = vrot.slane %v199_v22, %v4548_v10  ;;  %4402 = vst [vmem:[#allocation7 + $0x2d8] sm:$0xff] %v4286_v46  ;;  %v3715_v56 = vcombine.low %v1783_v44, %v1787_v49  ;;  %v1799_v57 = vrot.slane %v199_v22, %v4550_v11  ;;  %v1803_v58 = vrot.slane %v199_v22, %v4552_v12  ;;  %v133_v46 = vld [vmem:[#allocation5 + $0x308] sm:$0xff] }
 0x10c   :  { %v1807_v59 = vrot.slane %v200_v45, %v4538_v5  ;;  %v4287_v60 = vadd.f32 %v3696_v51, %v128_v47  ;;  %v3713_v61 = vcombine.low %v3705_v48, %v3712_v52  ;;  %v3722_v62 = vrot.slane %v3714_v53, %v4554_v14 }
 0x10d   :  { %v3731_v63 = vcombine.low %v1791_v50, %v1795_v54  ;;  %v3729_v0 = vrot.slane %v3715_v56, %v4554_v14  ;;  %v3732_v1 = vcombine.low %v1799_v57, %v1803_v58  ;;  %v1811_v2 = vrot.slane %v200_v45, %v4540_v6 }
 0x10e   :  { %v1815_v3 = vrot.slane %v200_v45, %v4542_v7  ;;  %4403 = vst [vmem:[#allocation7 + $0x2e0] sm:$0xff] %v4287_v60  ;;  %v4288_v13 = vadd.f32 %v3713_v61, %v129_v55  ;;  %v1819_v17 = vrot.slane %v200_v45, %v4544_v8  ;;  %v1823_v18 = vrot.slane %v200_v45, %v4546_v9  ;;  %v134_v61 = vld [vmem:[#allocation5 + $0x310] sm:$0xff] }
 0x10f   :  { %v3739_v16 = vrot.slane %v3731_v63, %v4554_v14  ;;  %v3730_v19 = vcombine.low %v3722_v62, %v3729_v0  ;;  %v3746_v20 = vrot.slane %v3732_v1, %v4554_v14  ;;  %v3748_v21 = vcombine.low %v1807_v59, %v1811_v2  ;;  %v203_v59 = vld [vmem:[#allocation2 + $0x198] sm:$0xff] }
 0x110   :  { %v1827_v22 = vrot.slane %v200_v45, %v4548_v10  ;;  %4404 = vst [vmem:[#allocation7 + $0x2e8] sm:$0xff] %v4288_v13  ;;  %v3749_v24 = vcombine.low %v1815_v3, %v1819_v17  ;;  %v1831_v25 = vrot.slane %v200_v45, %v4550_v11  ;;  %v1835_v26 = vrot.slane %v200_v45, %v4552_v12  ;;  %v135_v13 = vld [vmem:[#allocation5 + $0x318] sm:$0xff] }
 0x111   :  { %v1839_v27 = vrot.slane %v201_v4, %v4538_v5  ;;  %v4289_v28 = vadd.f32 %v3730_v19, %v130_v15  ;;  %v3747_v29 = vcombine.low %v3739_v16, %v3746_v20  ;;  %v3756_v30 = vrot.slane %v3748_v21, %v4554_v14 }
 0x112   :  { %v3765_v31 = vcombine.low %v1823_v18, %v1827_v22  ;;  %v3763_v32 = vrot.slane %v3749_v24, %v4554_v14  ;;  %v3766_v33 = vcombine.low %v1831_v25, %v1835_v26  ;;  %v1843_v34 = vrot.slane %v201_v4, %v4540_v6 }
 0x113   :  { %v1847_v35 = vrot.slane %v201_v4, %v4542_v7  ;;  %4405 = vst [vmem:[#allocation7 + $0x2f0] sm:$0xff] %v4289_v28  ;;  %v4290_v37 = vadd.f32 %v3747_v29, %v131_v23  ;;  %v1851_v40 = vrot.slane %v201_v4, %v4544_v8  ;;  %v1855_v41 = vrot.slane %v201_v4, %v4546_v9  ;;  %v136_v29 = vld [vmem:[#allocation5 + $0x320] sm:$0xff] }
 0x114   :  { %v3773_v39 = vrot.slane %v3765_v31, %v4554_v14  ;;  %v3764_v42 = vcombine.low %v3756_v30, %v3763_v32  ;;  %v3780_v43 = vrot.slane %v3766_v33, %v4554_v14  ;;  %v3782_v44 = vcombine.low %v1839_v27, %v1843_v34  ;;  %v204_v27 = vld [vmem:[#allocation2 + $0x1a0] sm:$0xff] }
 0x115   :  { %v1859_v45 = vrot.slane %v201_v4, %v4548_v10  ;;  %4406 = vst [vmem:[#allocation7 + $0x2f8] sm:$0xff] %v4290_v37  ;;  %v3783_v47 = vcombine.low %v1847_v35, %v1851_v40  ;;  %v1863_v48 = vrot.slane %v201_v4, %v4550_v11  ;;  %v1867_v49 = vrot.slane %v201_v4, %v4552_v12  ;;  %v137_v37 = vld [vmem:[#allocation5 + $0x328] sm:$0xff] }
 0x116   :  { %v1871_v50 = vrot.slane %v202_v36, %v4538_v5  ;;  %v4291_v51 = vadd.f32 %v3764_v42, %v132_v38  ;;  %v3781_v52 = vcombine.low %v3773_v39, %v3780_v43  ;;  %v3790_v53 = vrot.slane %v3782_v44, %v4554_v14 }
 0x117   :  { %v3799_v54 = vcombine.low %v1855_v41, %v1859_v45  ;;  %v3797_v55 = vrot.slane %v3783_v47, %v4554_v14  ;;  %v3800_v56 = vcombine.low %v1863_v48, %v1867_v49  ;;  %v1875_v57 = vrot.slane %v202_v36, %v4540_v6 }
 0x118   :  { %v1879_v58 = vrot.slane %v202_v36, %v4542_v7  ;;  %4407 = vst [vmem:[#allocation7 + $0x300] sm:$0xff] %v4291_v51  ;;  %v4292_v60 = vadd.f32 %v3781_v52, %v133_v46  ;;  %v1883_v63 = vrot.slane %v202_v36, %v4544_v8  ;;  %v1887_v0 = vrot.slane %v202_v36, %v4546_v9  ;;  %v138_v52 = vld [vmem:[#allocation5 + $0x330] sm:$0xff] }
 0x119   :  { %v3807_v62 = vrot.slane %v3799_v54, %v4554_v14  ;;  %v3798_v1 = vcombine.low %v3790_v53, %v3797_v55  ;;  %v3814_v2 = vrot.slane %v3800_v56, %v4554_v14  ;;  %v3816_v3 = vcombine.low %v1871_v50, %v1875_v57  ;;  %v205_v50 = vld [vmem:[#allocation2 + $0x1a8] sm:$0xff] }
 0x11a   :  { %v1891_v4 = vrot.slane %v202_v36, %v4548_v10  ;;  %4408 = vst [vmem:[#allocation7 + $0x308] sm:$0xff] %v4292_v60  ;;  %v3817_v15 = vcombine.low %v1879_v58, %v1883_v63  ;;  %v1895_v16 = vrot.slane %v202_v36, %v4550_v11  ;;  %v1899_v17 = vrot.slane %v202_v36, %v4552_v12  ;;  %v139_v60 = vld [vmem:[#allocation5 + $0x338] sm:$0xff] }
 0x11b   :  { %v1903_v18 = vrot.slane %v203_v59, %v4538_v5  ;;  %v4293_v19 = vadd.f32 %v3798_v1, %v134_v61  ;;  %v3815_v20 = vcombine.low %v3807_v62, %v3814_v2  ;;  %v3824_v21 = vrot.slane %v3816_v3, %v4554_v14 }
 0x11c   :  { %v3833_v22 = vcombine.low %v1887_v0, %v1891_v4  ;;  %v3831_v23 = vrot.slane %v3817_v15, %v4554_v14  ;;  %v3834_v24 = vcombine.low %v1895_v16, %v1899_v17  ;;  %v1907_v25 = vrot.slane %v203_v59, %v4540_v6 }
 0x11d   :  { %v1911_v26 = vrot.slane %v203_v59, %v4542_v7  ;;  %4409 = vst [vmem:[#allocation7 + $0x310] sm:$0xff] %v4293_v19  ;;  %v4294_v28 = vadd.f32 %v3815_v20, %v135_v13  ;;  %v1915_v31 = vrot.slane %v203_v59, %v4544_v8  ;;  %v1919_v32 = vrot.slane %v203_v59, %v4546_v9  ;;  %v140_v20 = vld [vmem:[#allocation5 + $0x340] sm:$0xff] }
 0x11e   :  { %v3841_v30 = vrot.slane %v3833_v22, %v4554_v14  ;;  %v3832_v33 = vcombine.low %v3824_v21, %v3831_v23  ;;  %v3848_v34 = vrot.slane %v3834_v24, %v4554_v14  ;;  %v3850_v35 = vcombine.low %v1903_v18, %v1907_v25  ;;  %v206_v18 = vld [vmem:[#allocation2 + $0x1b0] sm:$0xff] }
 0x11f   :  { %v1923_v36 = vrot.slane %v203_v59, %v4548_v10  ;;  %4410 = vst [vmem:[#allocation7 + $0x318] sm:$0xff] %v4294_v28  ;;  %v3851_v38 = vcombine.low %v1911_v26, %v1915_v31  ;;  %v1927_v39 = vrot.slane %v203_v59, %v4550_v11  ;;  %v1931_v40 = vrot.slane %v203_v59, %v4552_v12  ;;  %v141_v28 = vld [vmem:[#allocation5 + $0x348] sm:$0xff] }
 0x120   :  { %v1935_v41 = vrot.slane %v204_v27, %v4538_v5  ;;  %v4295_v42 = vadd.f32 %v3832_v33, %v136_v29  ;;  %v3849_v43 = vcombine.low %v3841_v30, %v3848_v34  ;;  %v3858_v44 = vrot.slane %v3850_v35, %v4554_v14 }
 0x121   :  { %v3867_v45 = vcombine.low %v1919_v32, %v1923_v36  ;;  %v3865_v46 = vrot.slane %v3851_v38, %v4554_v14  ;;  %v3868_v47 = vcombine.low %v1927_v39, %v1931_v40  ;;  %v1939_v48 = vrot.slane %v204_v27, %v4540_v6 }
 0x122   :  { %v1943_v49 = vrot.slane %v204_v27, %v4542_v7  ;;  %4411 = vst [vmem:[#allocation7 + $0x320] sm:$0xff] %v4295_v42  ;;  %v4296_v51 = vadd.f32 %v3849_v43, %v137_v37  ;;  %v1947_v54 = vrot.slane %v204_v27, %v4544_v8  ;;  %v1951_v55 = vrot.slane %v204_v27, %v4546_v9  ;;  %v142_v43 = vld [vmem:[#allocation5 + $0x350] sm:$0xff] }
 0x123   :  { %v3875_v53 = vrot.slane %v3867_v45, %v4554_v14  ;;  %v3866_v56 = vcombine.low %v3858_v44, %v3865_v46  ;;  %v3882_v57 = vrot.slane %v3868_v47, %v4554_v14  ;;  %v3884_v58 = vcombine.low %v1935_v41, %v1939_v48  ;;  %v207_v41 = vld [vmem:[#allocation2 + $0x1b8] sm:$0xff] }
 0x124   :  { %v1955_v59 = vrot.slane %v204_v27, %v4548_v10  ;;  %4412 = vst [vmem:[#allocation7 + $0x328] sm:$0xff] %v4296_v51  ;;  %v3885_v61 = vcombine.low %v1943_v49, %v1947_v54  ;;  %v1959_v62 = vrot.slane %v204_v27, %v4550_v11  ;;  %v1963_v63 = vrot.slane %v204_v27, %v4552_v12  ;;  %v143_v51 = vld [vmem:[#allocation5 + $0x358] sm:$0xff] }
 0x125   :  { %v1967_v0 = vrot.slane %v205_v50, %v4538_v5  ;;  %v4297_v1 = vadd.f32 %v3866_v56, %v138_v52  ;;  %v3883_v2 = vcombine.low %v3875_v53, %v3882_v57  ;;  %v3892_v3 = vrot.slane %v3884_v58, %v4554_v14 }
 0x126   :  { %v3901_v4 = vcombine.low %v1951_v55, %v1955_v59  ;;  %v3899_v13 = vrot.slane %v3885_v61, %v4554_v14  ;;  %v3902_v15 = vcombine.low %v1959_v62, %v1963_v63  ;;  %v1971_v16 = vrot.slane %v205_v50, %v4540_v6 }
 0x127   :  { %v1975_v17 = vrot.slane %v205_v50, %v4542_v7  ;;  %4413 = vst [vmem:[#allocation7 + $0x330] sm:$0xff] %v4297_v1  ;;  %v4298_v19 = vadd.f32 %v3883_v2, %v139_v60  ;;  %v1979_v22 = vrot.slane %v205_v50, %v4544_v8  ;;  %v1983_v23 = vrot.slane %v205_v50, %v4546_v9  ;;  %v144_v2 = vld [vmem:[#allocation5 + $0x360] sm:$0xff] }
 0x128   :  { %v3909_v21 = vrot.slane %v3901_v4, %v4554_v14  ;;  %v3900_v24 = vcombine.low %v3892_v3, %v3899_v13  ;;  %v3916_v25 = vrot.slane %v3902_v15, %v4554_v14  ;;  %v3918_v26 = vcombine.low %v1967_v0, %v1971_v16  ;;  %v208_v0 = vld [vmem:[#allocation2 + $0x1c0] sm:$0xff] }
 0x129   :  { %v1987_v27 = vrot.slane %v205_v50, %v4548_v10  ;;  %4414 = vst [vmem:[#allocation7 + $0x338] sm:$0xff] %v4298_v19  ;;  %v3919_v29 = vcombine.low %v1975_v17, %v1979_v22  ;;  %v1991_v30 = vrot.slane %v205_v50, %v4550_v11  ;;  %v1995_v31 = vrot.slane %v205_v50, %v4552_v12  ;;  %v145_v19 = vld [vmem:[#allocation5 + $0x368] sm:$0xff] }
 0x12a   :  { %v1999_v32 = vrot.slane %v206_v18, %v4538_v5  ;;  %v4299_v33 = vadd.f32 %v3900_v24, %v140_v20  ;;  %v3917_v34 = vcombine.low %v3909_v21, %v3916_v25  ;;  %v3926_v35 = vrot.slane %v3918_v26, %v4554_v14 }
 0x12b   :  { %v3935_v36 = vcombine.low %v1983_v23, %v1987_v27  ;;  %v3933_v37 = vrot.slane %v3919_v29, %v4554_v14  ;;  %v3936_v38 = vcombine.low %v1991_v30, %v1995_v31  ;;  %v2003_v39 = vrot.slane %v206_v18, %v4540_v6 }
 0x12c   :  { %v2007_v40 = vrot.slane %v206_v18, %v4542_v7  ;;  %4415 = vst [vmem:[#allocation7 + $0x340] sm:$0xff] %v4299_v33  ;;  %v4300_v42 = vadd.f32 %v3917_v34, %v141_v28  ;;  %v2011_v45 = vrot.slane %v206_v18, %v4544_v8  ;;  %v2015_v46 = vrot.slane %v206_v18, %v4546_v9  ;;  %v146_v34 = vld [vmem:[#allocation5 + $0x370] sm:$0xff] }
 0x12d   :  { %v3943_v44 = vrot.slane %v3935_v36, %v4554_v14  ;;  %v3934_v47 = vcombine.low %v3926_v35, %v3933_v37  ;;  %v3950_v48 = vrot.slane %v3936_v38, %v4554_v14  ;;  %v3952_v49 = vcombine.low %v1999_v32, %v2003_v39  ;;  %v209_v32 = vld [vmem:[#allocation2 + $0x1c8] sm:$0x3f] }
 0x12e   :  { %v2019_v50 = vrot.slane %v206_v18, %v4548_v10  ;;  %4416 = vst [vmem:[#allocation7 + $0x348] sm:$0xff] %v4300_v42  ;;  %v3953_v52 = vcombine.low %v2007_v40, %v2011_v45  ;;  %v2023_v53 = vrot.slane %v206_v18, %v4550_v11  ;;  %v2027_v54 = vrot.slane %v206_v18, %v4552_v12  ;;  %v147_v42 = vld [vmem:[#allocation5 + $0x378] sm:$0xff] }
 0x12f   :  { %v2031_v55 = vrot.slane %v207_v41, %v4538_v5  ;;  %v4301_v56 = vadd.f32 %v3934_v47, %v142_v43  ;;  %v3951_v57 = vcombine.low %v3943_v44, %v3950_v48  ;;  %v3960_v58 = vrot.slane %v3952_v49, %v4554_v14 }
 0x130   :  { %v3969_v59 = vcombine.low %v2015_v46, %v2019_v50  ;;  %v3967_v60 = vrot.slane %v3953_v52, %v4554_v14  ;;  %v3970_v61 = vcombine.low %v2023_v53, %v2027_v54  ;;  %v2035_v62 = vrot.slane %v207_v41, %v4540_v6 }
 0x131   :  { %v2039_v63 = vrot.slane %v207_v41, %v4542_v7  ;;  %4417 = vst [vmem:[#allocation7 + $0x350] sm:$0xff] %v4301_v56  ;;  %v4302_v1 = vadd.f32 %v3951_v57, %v143_v51  ;;  %v2043_v4 = vrot.slane %v207_v41, %v4544_v8  ;;  %v2047_v13 = vrot.slane %v207_v41, %v4546_v9  ;;  %v148_v56 = vld [vmem:[#allocation5 + $0x380] sm:$0xff] }
 0x132   :  { %v3977_v3 = vrot.slane %v3969_v59, %v4554_v14  ;;  %v3968_v15 = vcombine.low %v3960_v58, %v3967_v60  ;;  %v3984_v16 = vrot.slane %v3970_v61, %v4554_v14  ;;  %v3986_v17 = vcombine.low %v2031_v55, %v2035_v62  ;;  %v149_v61 = vld [vmem:[#allocation5 + $0x388] sm:$0xff] }
 0x133   :  { %v2051_v18 = vrot.slane %v207_v41, %v4548_v10  ;;  %4418 = vst [vmem:[#allocation7 + $0x358] sm:$0xff] %v4302_v1  ;;  %v3987_v20 = vcombine.low %v2039_v63, %v2043_v4  ;;  %v2055_v21 = vrot.slane %v207_v41, %v4550_v11  ;;  %v2059_v22 = vrot.slane %v207_v41, %v4552_v12 }
 0x134   :  { %v2063_v23 = vrot.slane %v208_v0, %v4538_v5  ;;  %v4303_v24 = vadd.f32 %v3968_v15, %v144_v2  ;;  %v3985_v25 = vcombine.low %v3977_v3, %v3984_v16  ;;  %v3994_v26 = vrot.slane %v3986_v17, %v4554_v14  ;;  %v151_v2 = vld [vmem:[#allocation5 + $0x398] sm:$0xf] }
 0x135   :  { %v4003_v27 = vcombine.low %v2047_v13, %v2051_v18  ;;  %v4001_v28 = vrot.slane %v3987_v20, %v4554_v14  ;;  %v4004_v29 = vcombine.low %v2055_v21, %v2059_v22  ;;  %v2067_v30 = vrot.slane %v208_v0, %v4540_v6 }
 0x136   :  { %v2071_v31 = vrot.slane %v208_v0, %v4542_v7  ;;  %4419 = vst [vmem:[#allocation7 + $0x360] sm:$0xff] %v4303_v24  ;;  %v4304_v33 = vadd.f32 %v3985_v25, %v145_v19  ;;  %v2075_v36 = vrot.slane %v208_v0, %v4544_v8  ;;  %v2079_v37 = vrot.slane %v208_v0, %v4546_v9 }
 0x137   :  { %v4011_v35 = vrot.slane %v4003_v27, %v4554_v14  ;;  %v4002_v38 = vcombine.low %v3994_v26, %v4001_v28  ;;  %v4018_v39 = vrot.slane %v4004_v29, %v4554_v14  ;;  %v4020_v40 = vcombine.low %v2063_v23, %v2067_v30 }
 0x138   :  { %v2083_v41 = vrot.slane %v208_v0, %v4548_v10  ;;  %4420 = vst [vmem:[#allocation7 + $0x368] sm:$0xff] %v4304_v33  ;;  %v4021_v43 = vcombine.low %v2071_v31, %v2075_v36  ;;  %v2087_v44 = vrot.slane %v208_v0, %v4550_v11  ;;  %v2091_v45 = vrot.slane %v208_v0, %v4552_v12 }
 0x139   :  { %v2095_v46 = vrot.slane %v209_v32, %v4538_v5  ;;  %v4305_v47 = vadd.f32 %v4002_v38, %v146_v34  ;;  %v4019_v48 = vcombine.low %v4011_v35, %v4018_v39  ;;  %v4028_v49 = vrot.slane %v4020_v40, %v4554_v14 }
 0x13a   :  { %v4037_v50 = vcombine.low %v2079_v37, %v2083_v41  ;;  %v4035_v51 = vrot.slane %v4021_v43, %v4554_v14  ;;  %v4038_v52 = vcombine.low %v2087_v44, %v2091_v45  ;;  %v2099_v53 = vrot.slane %v209_v32, %v4540_v6 }
 0x13b   :  { %v2103_v54 = vrot.slane %v209_v32, %v4542_v7  ;;  %4421 = vst [vmem:[#allocation7 + $0x370] sm:$0xff] %v4305_v47  ;;  %v4306_v55 = vadd.f32 %v4019_v48, %v147_v42  ;;  %v2107_v12 = vrot.slane %v209_v32, %v4544_v8  ;;  %v2111_v5 = vrot.slane %v209_v32, %v4546_v9  ;;  %v150_v9 = vld [vmem:[#allocation5 + $0x390] sm:$0xff] }
 0x13c   :  { %v4045_v11 = vrot.slane %v4037_v50, %v4554_v14  ;;  %v4036_v57 = vcombine.low %v4028_v49, %v4035_v51  ;;  %v4052_v58 = vrot.slane %v4038_v52, %v4554_v14  ;;  %v4054_v59 = vcombine.low %v2095_v46, %v2099_v53 }
 0x13d   :  { %v2115_v60 = vrot.slane %v209_v32, %v4548_v10  ;;  %4422 = vst [vmem:[#allocation7 + $0x378] sm:$0xff] %v4306_v55  ;;  %v4055_v6 = vcombine.low %v2103_v54, %v2107_v12 }
 0x13e   :  { %v4307_v62 = vadd.f32 %v4036_v57, %v148_v56  ;;  %v4053_v7 = vcombine.low %v4045_v11, %v4052_v58  ;;  %v4062_v63 = vrot.slane %v4054_v59, %v4554_v14 }
 0x13f   :  { %v4071_v0 = vcombine.low %v2111_v5, %v2115_v60  ;;  %v4069_v1 = vrot.slane %v4055_v6, %v4554_v14 }
 0x140   :  { %4423 = vst [vmem:[#allocation7 + $0x380] sm:$0xff] %v4307_v62  ;;  %v4308_v8 = vadd.f32 %v4053_v7, %v149_v61 }
 0x141   :  { %v4078_v3 = vrot.slane %v4071_v0, %v4554_v14  ;;  %v4070_v4 = vcombine.low %v4062_v63, %v4069_v1 }
 0x142   :  { %4424 = vst [vmem:[#allocation7 + $0x388] sm:$0xff] %v4308_v8 }
 0x143   :  { %v4310_v10 = vadd.f32 %v4078_v3, %v151_v2  ;;  %v4309_v13 = vadd.f32 %v4070_v4, %v150_v9 }
 0x145   :  { %4426 = vst [vmem:[#allocation7 + $0x398] sm:$0xf] %v4310_v10  ;;  %4425 = vst [vmem:[#allocation7 + $0x390] sm:$0xff] %v4309_v13 }
 0x146   :  { %4498 = shalt.err (!%p4495_p0)
}
 0x147   :  { %4436 = dma.vmem_to_hbm [thread:$0]  %s4434_s1, 14784, %s5254_s2, [#allocation4]  }
 0x148   :  { %4511 = dma.done.wait [#allocation4], 14784  }
 0x149   :  { %4512 = vsyncadd [#allocation4], 4294952512 }
 0x14a   :  { %4440 = vsyncpa [#allocation3], 1 }
 0x14b   :  { %4441 = vsyncpa [#allocation6], 1 }
 0x14c   :  { %4442 = vsyncpa [#allocation4], 1 }

</bundles_post_ra>
